<compile_context>
chip_gen: v7x
topology: tpu7x:2x2x1
jax: 0.10.0
libtpu: 0.0.40
codegen_flags: <defaults>
</compile_context>

<pallas_src>
import functools

import jax
import jax.numpy as jnp
from jax import lax
from jax.experimental import pallas as pl
from jax.experimental.pallas import tpu as pltpu


def _modality_attention_kernel(nv_q_ref, rv_q_ref, nv_kv_ref, rv_kv_ref,
                               wqn_ref, wkn_ref, wqr_ref, wkr_ref,
                               bqn_ref, bkn_ref, bqr_ref, bkr_ref,
                               noise_ref, rgb_ref,
                               nk_ref, rk_ref, *, heads, head_dim):
    H, D = heads, head_dim

    # Key projections over the full kv side: compute once per batch (first query
    # tile) and reuse from VMEM scratch for all remaining query tiles.
    @pl.when(pl.program_id(1) == 0)
    def _():
        nk_ref[...] = (jnp.dot(nv_kv_ref[0], wkn_ref[...],
                               preferred_element_type=jnp.float32)
                       + bkn_ref[...]).astype(jnp.bfloat16)        # (N, C)
        rk_ref[...] = (jnp.dot(rv_kv_ref[0], wkr_ref[...],
                               preferred_element_type=jnp.float32)
                       + bkr_ref[...]).astype(jnp.bfloat16)        # (N, C)

    # Query projections for this tile only (scale already folded into weights).
    nq = (jnp.dot(nv_q_ref[0], wqn_ref[...], preferred_element_type=jnp.float32)
          + bqn_ref[...]).astype(jnp.bfloat16)                     # (TQ, C)
    rq = (jnp.dot(rv_q_ref[0], wqr_ref[...], preferred_element_type=jnp.float32)
          + bqr_ref[...]).astype(jnp.bfloat16)                     # (TQ, C)

    # Contract over head_dim of both operands (no explicit .T / transpose).
    dn = (((1,), (1,)), ((), ()))

    def attend(q_proj, k_ref, v_ref, out_ref):
        # Per-head logits (scale pre-folded).
        logits = []
        for h in range(H):
            lo, hi = h * D, (h + 1) * D
            logits.append(lax.dot_general(q_proj[:, lo:hi], k_ref[:, lo:hi], dn,
                                          preferred_element_type=jnp.float32))

        # Softmax over the HEADS axis (torch.nn.Softmax(dim=1) on (b, h, n, m)).
        m = logits[0]
        for a in logits[1:]:
            m = jnp.maximum(m, a)
        s = None
        for h in range(H):
            e = jnp.exp(logits[h] - m)
            logits[h] = e
            s = e if s is None else s + e
        inv = pl.reciprocal(s, approx=True)

        # Attention-weighted values (values are the raw inputs, per-head columns);
        # normalisation fused into the P operand, single lane-dense store.
        cols = []
        for h in range(H):
            lo, hi = h * D, (h + 1) * D
            p = (logits[h] * inv).astype(jnp.bfloat16)
            cols.append(jnp.dot(p, v_ref[0, :, lo:hi],
                                preferred_element_type=jnp.float32))
        out_ref[0] = jnp.concatenate(cols, axis=-1).astype(out_ref.dtype)

    # noise = softmax_h(noise_q @ rgb_k^T) @ rv ;  rgb = softmax_h(rgb_q @ noise_k^T) @ nv
    attend(nq, rk_ref, rv_kv_ref, noise_ref)
    attend(rq, nk_ref, nv_kv_ref, rgb_ref)


def _pick_q_tile(n, target=256):
    """Largest query tile <= target that divides N and keeps (8,128) legality."""
    if n <= target:
        return n
    start = target - (target % 8)
    for tq in range(start, 7, -8):
        if n % tq == 0:
            return tq
    return n


def modality_attention(nv, rv, w_noise_kv, b_noise_kv, w_rgb_kv, b_rgb_kv, heads):
    """nv, rv: (B, N, C) with C = heads * head_dim.  Returns (noise, rgb) in f32."""
    B, N, C = nv.shape
    assert C % heads == 0
    D = C // heads
    scale = float(D) ** -0.5
    TQ = _pick_q_tile(N)
    n_qt = N // TQ

    # Host-side weight prep: split Q/K halves of the (2C, C) Linear weights,
    # transpose to (C, C) (so the kernel never transposes), fold the attention
    # scale into the Q halves, cast matmul operands to bf16.
    wqn = (w_noise_kv[:C].T * scale).astype(jnp.bfloat16)
    wkn = w_noise_kv[C:].T.astype(jnp.bfloat16)
    wqr = (w_rgb_kv[:C].T * scale).astype(jnp.bfloat16)
    wkr = w_rgb_kv[C:].T.astype(jnp.bfloat16)
    bqn = (b_noise_kv[:C] * scale).reshape(1, C).astype(jnp.float32)
    bkn = b_noise_kv[C:].reshape(1, C).astype(jnp.float32)
    bqr = (b_rgb_kv[:C] * scale).reshape(1, C).astype(jnp.float32)
    bkr = b_rgb_kv[C:].reshape(1, C).astype(jnp.float32)

    nv16 = nv.astype(jnp.bfloat16)
    rv16 = rv.astype(jnp.bfloat16)

    kernel = functools.partial(_modality_attention_kernel, heads=heads, head_dim=D)

    q_spec = pl.BlockSpec((1, TQ, C), lambda b, q: (b, q, 0))     # query tile
    kv_spec = pl.BlockSpec((1, N, C), lambda b, q: (b, 0, 0))     # full key/value side
    w_spec = pl.BlockSpec((C, C), lambda b, q: (0, 0))
    bias_spec = pl.BlockSpec((1, C), lambda b, q: (0, 0))
    out_spec = pl.BlockSpec((1, TQ, C), lambda b, q: (b, q, 0))
    out_shape = jax.ShapeDtypeStruct((B, N, C), jnp.float32)

    noise, rgb = pl.pallas_call(
        kernel,
        out_shape=(out_shape, out_shape),
        grid_spec=pltpu.PrefetchScalarGridSpec(
            num_scalar_prefetch=0,
            grid=(B, n_qt),
            in_specs=[q_spec, q_spec, kv_spec, kv_spec,
                      w_spec, w_spec, w_spec, w_spec,
                      bias_spec, bias_spec, bias_spec, bias_spec],
            out_specs=[out_spec, out_spec],
            scratch_shapes=[pltpu.VMEM((N, C), jnp.bfloat16),   # cached noise_k
                            pltpu.VMEM((N, C), jnp.bfloat16)],  # cached rgb_k
        ),
        compiler_params=pltpu.CompilerParams(
            # q axis carries the cached key projections in scratch -> "arbitrary";
            # batch axis stays "parallel" for megacore sharding.
            dimension_semantics=("parallel", "arbitrary"),
            vmem_limit_bytes=48 * 1024 * 1024),
    )(nv16, rv16, nv16, rv16, wqn, wkn, wqr, wkr, bqn, bkn, bqr, bkr)
    return noise, rgb


def _reference(nv, rv, w_n, b_n, w_r, b_r, heads):
    """Pure-JAX f32 reference mirroring the PyTorch forward exactly."""
    B, N, C = nv.shape
    D = C // heads
    scale = float(D) ** -0.5

    def split_heads(x):  # 'b n (h d) -> b h n d'
        return x.reshape(B, N, heads, D).transpose(0, 2, 1, 3)

    nkv = nv @ w_n.T + b_n
    rkv = rv @ w_r.T + b_r
    noise_q, noise_k = split_heads(nkv[..., :C]), split_heads(nkv[..., C:])
    rgb_q, rgb_k = split_heads(rkv[..., :C]), split_heads(rkv[..., C:])

    attn1 = jnp.einsum('bhnd,bhmd->bhnm', noise_q, rgb_k) * scale
    attn2 = jnp.einsum('bhnd,bhmd->bhnm', rgb_q, noise_k) * scale
    sm1 = jax.nn.softmax(attn1, axis=1)   # softmax over HEADS, as in torch code
    sm2 = jax.nn.softmax(attn2, axis=1)

    rv_h = split_heads(rv)
    nv_h = split_heads(nv)
    noise = jnp.einsum('bhnm,bhmd->bhnd', sm1, rv_h)
    rgb = jnp.einsum('bhnm,bhmd->bhnd', sm2, nv_h)
    merge = lambda x: x.transpose(0, 2, 1, 3).reshape(B, N, C)
    return merge(noise), merge(rgb)


if __name__ == "__main__":
    # Small shapes consistent with the module: in_dim = heads * head_dim.
    B, N = 2, 8
    heads, head_dim = 4, 8
    C = heads * head_dim           # in_dim = 32

    key = jax.random.PRNGKey(0)
    k1, k2, k3, k4, k5, k6 = jax.random.split(key, 6)

    nv = jax.random.normal(k1, (B, N, C), dtype=jnp.float32)
    rv = jax.random.normal(k2, (B, N, C), dtype=jnp.float32)

    # Deterministic Linear params (nn.Linear(in_dim, 2*in_dim) shapes).
    bound = 1.0 / (C ** 0.5)
    w_noise_kv = jax.random.uniform(k3, (2 * C, C), jnp.float32, -bound, bound)
    b_noise_kv = jax.random.uniform(k4, (2 * C,), jnp.float32, -bound, bound)
    w_rgb_kv = jax.random.uniform(k5, (2 * C, C), jnp.float32, -bound, bound)
    b_rgb_kv = jax.random.uniform(k6, (2 * C,), jnp.float32, -bound, bound)

    # TODO(synk): out1/out2 (Linear+Dropout) are defined in __init__ but never
    # called in forward, so they are intentionally not part of the kernel.
    noise, rgb = modality_attention(nv, rv, w_noise_kv, b_noise_kv,
                                    w_rgb_kv, b_rgb_kv, heads)
    jax.block_until_ready((noise, rgb))

    noise_ref, rgb_ref = _reference(nv, rv, w_noise_kv, b_noise_kv,
                                    w_rgb_kv, b_rgb_kv, heads)
    # bf16 MXU operands + approx reciprocal -> loosen tolerance vs. f32 reference.
    assert jnp.allclose(noise, noise_ref, atol=6e-2, rtol=5e-2)
    assert jnp.allclose(rgb, rgb_ref, atol=6e-2, rtol=5e-2)

    print("KERNEL_OK")
</pallas_src>

<mosaic_0001>
module attributes {stable_mosaic.version = 11 : i64} {
  func.func @_modality_attention_kernel(%arg0: i32, %arg1: i32, %arg2: memref<1x8x32xbf16, #tpu.memory_space<vmem>>, %arg3: memref<1x8x32xbf16, #tpu.memory_space<vmem>>, %arg4: memref<1x8x32xbf16, #tpu.memory_space<vmem>>, %arg5: memref<1x8x32xbf16, #tpu.memory_space<vmem>>, %arg6: memref<32x32xbf16, #tpu.memory_space<vmem>>, %arg7: memref<32x32xbf16, #tpu.memory_space<vmem>>, %arg8: memref<32x32xbf16, #tpu.memory_space<vmem>>, %arg9: memref<32x32xbf16, #tpu.memory_space<vmem>>, %arg10: memref<1x32xf32, #tpu.memory_space<vmem>>, %arg11: memref<1x32xf32, #tpu.memory_space<vmem>>, %arg12: memref<1x32xf32, #tpu.memory_space<vmem>>, %arg13: memref<1x32xf32, #tpu.memory_space<vmem>>, %arg14: memref<1x8x32xf32, #tpu.memory_space<vmem>>, %arg15: memref<1x8x32xf32, #tpu.memory_space<vmem>>, %arg16: memref<8x32xbf16, #tpu.memory_space<vmem>>, %arg17: memref<8x32xbf16, #tpu.memory_space<vmem>>) attributes {dimension_semantics = [#tpu.dimension_semantics<parallel>, #tpu.dimension_semantics<arbitrary>], iteration_bounds = array<i64: 2, 1>, scalar_prefetch = 0 : i64, scratch_operands = 2 : i64, tpu.core_type = #tpu.core_type<tc>, window_params = [{transform_indices = @transform_0, window_bounds = array<i64: 1, 8, 32>}, {transform_indices = @transform_1, window_bounds = array<i64: 1, 8, 32>}, {transform_indices = @transform_2, window_bounds = array<i64: 1, 8, 32>}, {transform_indices = @transform_3, window_bounds = array<i64: 1, 8, 32>}, {pipeline_mode = #tpu.pipeline_mode<synchronous>, transform_indices = @transform_4, window_bounds = array<i64: 32, 32>}, {pipeline_mode = #tpu.pipeline_mode<synchronous>, transform_indices = @transform_5, window_bounds = array<i64: 32, 32>}, {pipeline_mode = #tpu.pipeline_mode<synchronous>, transform_indices = @transform_6, window_bounds = array<i64: 32, 32>}, {pipeline_mode = #tpu.pipeline_mode<synchronous>, transform_indices = @transform_7, window_bounds = array<i64: 32, 32>}, {pipeline_mode = #tpu.pipeline_mode<synchronous>, transform_indices = @transform_8, window_bounds = array<i64: 1, 32>}, {pipeline_mode = #tpu.pipeline_mode<synchronous>, transform_indices = @transform_9, window_bounds = array<i64: 1, 32>}, {pipeline_mode = #tpu.pipeline_mode<synchronous>, transform_indices = @transform_10, window_bounds = array<i64: 1, 32>}, {pipeline_mode = #tpu.pipeline_mode<synchronous>, transform_indices = @transform_11, window_bounds = array<i64: 1, 32>}, {transform_indices = @transform_12, window_bounds = array<i64: 1, 8, 32>}, {transform_indices = @transform_13, window_bounds = array<i64: 1, 8, 32>}]} {
    %c0_i32 = arith.constant 0 : i32
    %0 = arith.cmpi eq, %arg1, %c0_i32 : i32
    %1 = arith.extui %0 : i1 to i32
    %c0_i32_0 = arith.constant 0 : i32
    %2 = arith.cmpi ne, %1, %c0_i32_0 : i32
    scf.if %2 {
      %c0_74 = arith.constant 0 : index
      %c0_75 = arith.constant 0 : index
      %c0_76 = arith.constant 0 : index
      %121 = vector.load %arg4[%c0_74, %c0_75, %c0_76] : memref<1x8x32xbf16, #tpu.memory_space<vmem>>, vector<1x8x32xbf16>
      %122 = vector.shape_cast %121 : vector<1x8x32xbf16> to vector<8x32xbf16>
      %c0_77 = arith.constant 0 : index
      %c0_78 = arith.constant 0 : index
      %123 = vector.load %arg7[%c0_77, %c0_78] : memref<32x32xbf16, #tpu.memory_space<vmem>>, vector<32x32xbf16>
      %cst_79 = arith.constant dense<0.000000e+00> : vector<8x32xf32>
      %124 = tpu.matmul %122, %123, %cst_79 {dimension_numbers = #tpu.dot_dimension_numbers<[1], [0], [0], [1], [0, 0, 1, 1], [], []>} : vector<8x32xbf16>, vector<32x32xbf16>, vector<8x32xf32> -> vector<8x32xf32>
      %c0_80 = arith.constant 0 : index
      %c0_81 = arith.constant 0 : index
      %125 = vector.load %arg11[%c0_80, %c0_81] : memref<1x32xf32, #tpu.memory_space<vmem>>, vector<1x32xf32>
      %126 = vector.broadcast %125 : vector<1x32xf32> to vector<8x32xf32>
      %127 = arith.addf %124, %126 : vector<8x32xf32>
      %128 = arith.truncf %127 : vector<8x32xf32> to vector<8x32xbf16>
      %c0_82 = arith.constant 0 : index
      %c0_83 = arith.constant 0 : index
      %129 = vector.load %arg16[%c0_82, %c0_83] : memref<8x32xbf16, #tpu.memory_space<vmem>>, vector<8x32xbf16>
      tpu.vector_store %arg16[%c0_82, %c0_83], %128 {strides = array<i32>} : memref<8x32xbf16, #tpu.memory_space<vmem>>, vector<8x32xbf16>,
      %c0_84 = arith.constant 0 : index
      %c0_85 = arith.constant 0 : index
      %c0_86 = arith.constant 0 : index
      %130 = vector.load %arg5[%c0_84, %c0_85, %c0_86] : memref<1x8x32xbf16, #tpu.memory_space<vmem>>, vector<1x8x32xbf16>
      %131 = vector.shape_cast %130 : vector<1x8x32xbf16> to vector<8x32xbf16>
      %c0_87 = arith.constant 0 : index
      %c0_88 = arith.constant 0 : index
      %132 = vector.load %arg9[%c0_87, %c0_88] : memref<32x32xbf16, #tpu.memory_space<vmem>>, vector<32x32xbf16>
      %cst_89 = arith.constant dense<0.000000e+00> : vector<8x32xf32>
      %133 = tpu.matmul %131, %132, %cst_89 {dimension_numbers = #tpu.dot_dimension_numbers<[1], [0], [0], [1], [0, 0, 1, 1], [], []>} : vector<8x32xbf16>, vector<32x32xbf16>, vector<8x32xf32> -> vector<8x32xf32>
      %c0_90 = arith.constant 0 : index
      %c0_91 = arith.constant 0 : index
      %134 = vector.load %arg13[%c0_90, %c0_91] : memref<1x32xf32, #tpu.memory_space<vmem>>, vector<1x32xf32>
      %135 = vector.broadcast %134 : vector<1x32xf32> to vector<8x32xf32>
      %136 = arith.addf %133, %135 : vector<8x32xf32>
      %137 = arith.truncf %136 : vector<8x32xf32> to vector<8x32xbf16>
      %c0_92 = arith.constant 0 : index
      %c0_93 = arith.constant 0 : index
      %138 = vector.load %arg17[%c0_92, %c0_93] : memref<8x32xbf16, #tpu.memory_space<vmem>>, vector<8x32xbf16>
      tpu.vector_store %arg17[%c0_92, %c0_93], %137 {strides = array<i32>} : memref<8x32xbf16, #tpu.memory_space<vmem>>, vector<8x32xbf16>,
    } else {
    }
    %c0 = arith.constant 0 : index
    %c0_1 = arith.constant 0 : index
    %c0_2 = arith.constant 0 : index
    %3 = vector.load %arg2[%c0, %c0_1, %c0_2] : memref<1x8x32xbf16, #tpu.memory_space<vmem>>, vector<1x8x32xbf16>
    %4 = vector.shape_cast %3 : vector<1x8x32xbf16> to vector<8x32xbf16>
    %c0_3 = arith.constant 0 : index
    %c0_4 = arith.constant 0 : index
    %5 = vector.load %arg6[%c0_3, %c0_4] : memref<32x32xbf16, #tpu.memory_space<vmem>>, vector<32x32xbf16>
    %cst = arith.constant dense<0.000000e+00> : vector<8x32xf32>
    %6 = tpu.matmul %4, %5, %cst {dimension_numbers = #tpu.dot_dimension_numbers<[1], [0], [0], [1], [0, 0, 1, 1], [], []>} : vector<8x32xbf16>, vector<32x32xbf16>, vector<8x32xf32> -> vector<8x32xf32>
    %c0_5 = arith.constant 0 : index
    %c0_6 = arith.constant 0 : index
    %7 = vector.load %arg10[%c0_5, %c0_6] : memref<1x32xf32, #tpu.memory_space<vmem>>, vector<1x32xf32>
    %8 = vector.broadcast %7 : vector<1x32xf32> to vector<8x32xf32>
    %9 = arith.addf %6, %8 : vector<8x32xf32>
    %10 = arith.truncf %9 : vector<8x32xf32> to vector<8x32xbf16>
    %c0_7 = arith.constant 0 : index
    %c0_8 = arith.constant 0 : index
    %c0_9 = arith.constant 0 : index
    %11 = vector.load %arg3[%c0_7, %c0_8, %c0_9] : memref<1x8x32xbf16, #tpu.memory_space<vmem>>, vector<1x8x32xbf16>
    %12 = vector.shape_cast %11 : vector<1x8x32xbf16> to vector<8x32xbf16>
    %c0_10 = arith.constant 0 : index
    %c0_11 = arith.constant 0 : index
    %13 = vector.load %arg8[%c0_10, %c0_11] : memref<32x32xbf16, #tpu.memory_space<vmem>>, vector<32x32xbf16>
    %cst_12 = arith.constant dense<0.000000e+00> : vector<8x32xf32>
    %14 = tpu.matmul %12, %13, %cst_12 {dimension_numbers = #tpu.dot_dimension_numbers<[1], [0], [0], [1], [0, 0, 1, 1], [], []>} : vector<8x32xbf16>, vector<32x32xbf16>, vector<8x32xf32> -> vector<8x32xf32>
    %c0_13 = arith.constant 0 : index
    %c0_14 = arith.constant 0 : index
    %15 = vector.load %arg12[%c0_13, %c0_14] : memref<1x32xf32, #tpu.memory_space<vmem>>, vector<1x32xf32>
    %16 = vector.broadcast %15 : vector<1x32xf32> to vector<8x32xf32>
    %17 = arith.addf %14, %16 : vector<8x32xf32>
    %18 = arith.truncf %17 : vector<8x32xf32> to vector<8x32xbf16>
    %19 = vector.extract_strided_slice %10 {offsets = [0, 0], sizes = [8, 8], strides = [1, 1]} : vector<8x32xbf16> to vector<8x8xbf16>
    %c0_15 = arith.constant 0 : index
    %c0_16 = arith.constant 0 : index
    %20 = vector.load %arg17[%c0_15, %c0_16] : memref<8x32xbf16, #tpu.memory_space<vmem>>, vector<8x8xbf16>
    %cst_17 = arith.constant dense<0.000000e+00> : vector<8x8xf32>
    %21 = tpu.matmul %19, %20, %cst_17 {dimension_numbers = #tpu.dot_dimension_numbers<[1], [1], [0], [0], [0, 0, 1, 0], [], []>} : vector<8x8xbf16>, vector<8x8xbf16>, vector<8x8xf32> -> vector<8x8xf32>
    %22 = vector.extract_strided_slice %10 {offsets = [0, 8], sizes = [8, 8], strides = [1, 1]} : vector<8x32xbf16> to vector<8x8xbf16>
    %c0_18 = arith.constant 0 : index
    %c8 = arith.constant 8 : index
    %23 = vector.load %arg17[%c0_18, %c8] : memref<8x32xbf16, #tpu.memory_space<vmem>>, vector<8x8xbf16>
    %cst_19 = arith.constant dense<0.000000e+00> : vector<8x8xf32>
    %24 = tpu.matmul %22, %23, %cst_19 {dimension_numbers = #tpu.dot_dimension_numbers<[1], [1], [0], [0], [0, 0, 1, 0], [], []>} : vector<8x8xbf16>, vector<8x8xbf16>, vector<8x8xf32> -> vector<8x8xf32>
    %25 = vector.extract_strided_slice %10 {offsets = [0, 16], sizes = [8, 8], strides = [1, 1]} : vector<8x32xbf16> to vector<8x8xbf16>
    %c0_20 = arith.constant 0 : index
    %c16 = arith.constant 16 : index
    %26 = vector.load %arg17[%c0_20, %c16] : memref<8x32xbf16, #tpu.memory_space<vmem>>, vector<8x8xbf16>
    %cst_21 = arith.constant dense<0.000000e+00> : vector<8x8xf32>
    %27 = tpu.matmul %25, %26, %cst_21 {dimension_numbers = #tpu.dot_dimension_numbers<[1], [1], [0], [0], [0, 0, 1, 0], [], []>} : vector<8x8xbf16>, vector<8x8xbf16>, vector<8x8xf32> -> vector<8x8xf32>
    %28 = vector.extract_strided_slice %10 {offsets = [0, 24], sizes = [8, 8], strides = [1, 1]} : vector<8x32xbf16> to vector<8x8xbf16>
    %c0_22 = arith.constant 0 : index
    %c24 = arith.constant 24 : index
    %29 = vector.load %arg17[%c0_22, %c24] : memref<8x32xbf16, #tpu.memory_space<vmem>>, vector<8x8xbf16>
    %cst_23 = arith.constant dense<0.000000e+00> : vector<8x8xf32>
    %30 = tpu.matmul %28, %29, %cst_23 {dimension_numbers = #tpu.dot_dimension_numbers<[1], [1], [0], [0], [0, 0, 1, 0], [], []>} : vector<8x8xbf16>, vector<8x8xbf16>, vector<8x8xf32> -> vector<8x8xf32>
    %31 = arith.maximumf %21, %24 : vector<8x8xf32>
    %32 = arith.maximumf %31, %27 : vector<8x8xf32>
    %33 = arith.maximumf %32, %30 : vector<8x8xf32>
    %34 = arith.subf %21, %33 : vector<8x8xf32>
    %35 = math.exp %34 : vector<8x8xf32>
    %36 = arith.subf %24, %33 : vector<8x8xf32>
    %37 = math.exp %36 : vector<8x8xf32>
    %38 = arith.addf %35, %37 : vector<8x8xf32>
    %39 = arith.subf %27, %33 : vector<8x8xf32>
    %40 = math.exp %39 : vector<8x8xf32>
    %41 = arith.addf %38, %40 : vector<8x8xf32>
    %42 = arith.subf %30, %33 : vector<8x8xf32>
    %43 = math.exp %42 : vector<8x8xf32>
    %44 = arith.addf %41, %43 : vector<8x8xf32>
    %45 = tpu.reciprocal %44 {approx = true} : vector<8x8xf32> -> vector<8x8xf32>
    %46 = arith.mulf %35, %45 : vector<8x8xf32>
    %47 = arith.truncf %46 : vector<8x8xf32> to vector<8x8xbf16>
    %c0_24 = arith.constant 0 : index
    %c0_25 = arith.constant 0 : index
    %c0_26 = arith.constant 0 : index
    %48 = vector.load %arg5[%c0_24, %c0_25, %c0_26] : memref<1x8x32xbf16, #tpu.memory_space<vmem>>, vector<1x8x8xbf16>
    %49 = vector.shape_cast %48 : vector<1x8x8xbf16> to vector<8x8xbf16>
    %cst_27 = arith.constant dense<0.000000e+00> : vector<8x8xf32>
    %50 = tpu.matmul %47, %49, %cst_27 {dimension_numbers = #tpu.dot_dimension_numbers<[1], [0], [0], [1], [0, 0, 1, 1], [], []>} : vector<8x8xbf16>, vector<8x8xbf16>, vector<8x8xf32> -> vector<8x8xf32>
    %51 = arith.mulf %37, %45 : vector<8x8xf32>
    %52 = arith.truncf %51 : vector<8x8xf32> to vector<8x8xbf16>
    %c0_28 = arith.constant 0 : index
    %c0_29 = arith.constant 0 : index
    %c8_30 = arith.constant 8 : index
    %53 = vector.load %arg5[%c0_28, %c0_29, %c8_30] : memref<1x8x32xbf16, #tpu.memory_space<vmem>>, vector<1x8x8xbf16>
    %54 = vector.shape_cast %53 : vector<1x8x8xbf16> to vector<8x8xbf16>
    %cst_31 = arith.constant dense<0.000000e+00> : vector<8x8xf32>
    %55 = tpu.matmul %52, %54, %cst_31 {dimension_numbers = #tpu.dot_dimension_numbers<[1], [0], [0], [1], [0, 0, 1, 1], [], []>} : vector<8x8xbf16>, vector<8x8xbf16>, vector<8x8xf32> -> vector<8x8xf32>
    %56 = arith.mulf %40, %45 : vector<8x8xf32>
    %57 = arith.truncf %56 : vector<8x8xf32> to vector<8x8xbf16>
    %c0_32 = arith.constant 0 : index
    %c0_33 = arith.constant 0 : index
    %c16_34 = arith.constant 16 : index
    %58 = vector.load %arg5[%c0_32, %c0_33, %c16_34] : memref<1x8x32xbf16, #tpu.memory_space<vmem>>, vector<1x8x8xbf16>
    %59 = vector.shape_cast %58 : vector<1x8x8xbf16> to vector<8x8xbf16>
    %cst_35 = arith.constant dense<0.000000e+00> : vector<8x8xf32>
    %60 = tpu.matmul %57, %59, %cst_35 {dimension_numbers = #tpu.dot_dimension_numbers<[1], [0], [0], [1], [0, 0, 1, 1], [], []>} : vector<8x8xbf16>, vector<8x8xbf16>, vector<8x8xf32> -> vector<8x8xf32>
    %61 = arith.mulf %43, %45 : vector<8x8xf32>
    %62 = arith.truncf %61 : vector<8x8xf32> to vector<8x8xbf16>
    %c0_36 = arith.constant 0 : index
    %c0_37 = arith.constant 0 : index
    %c24_38 = arith.constant 24 : index
    %63 = vector.load %arg5[%c0_36, %c0_37, %c24_38] : memref<1x8x32xbf16, #tpu.memory_space<vmem>>, vector<1x8x8xbf16>
    %64 = vector.shape_cast %63 : vector<1x8x8xbf16> to vector<8x8xbf16>
    %cst_39 = arith.constant dense<0.000000e+00> : vector<8x8xf32>
    %65 = tpu.matmul %62, %64, %cst_39 {dimension_numbers = #tpu.dot_dimension_numbers<[1], [0], [0], [1], [0, 0, 1, 1], [], []>} : vector<8x8xbf16>, vector<8x8xbf16>, vector<8x8xf32> -> vector<8x8xf32>
    %66 = tpu.concatenate %50, %55, %60, %65 in 1 : vector<8x8xf32>, vector<8x8xf32>, vector<8x8xf32>, vector<8x8xf32> -> vector<8x32xf32>
    %c0_40 = arith.constant 0 : index
    %c0_41 = arith.constant 0 : index
    %c0_42 = arith.constant 0 : index
    %67 = vector.load %arg14[%c0_40, %c0_41, %c0_42] : memref<1x8x32xf32, #tpu.memory_space<vmem>>, vector<1x8x32xf32>
    %68 = vector.shape_cast %67 : vector<1x8x32xf32> to vector<8x32xf32>
    %69 = vector.shape_cast %66 : vector<8x32xf32> to vector<1x8x32xf32>
    tpu.vector_store %arg14[%c0_40, %c0_41, %c0_42], %69 {strides = array<i32>} : memref<1x8x32xf32, #tpu.memory_space<vmem>>, vector<1x8x32xf32>,
    %70 = vector.extract_strided_slice %18 {offsets = [0, 0], sizes = [8, 8], strides = [1, 1]} : vector<8x32xbf16> to vector<8x8xbf16>
    %c0_43 = arith.constant 0 : index
    %c0_44 = arith.constant 0 : index
    %71 = vector.load %arg16[%c0_43, %c0_44] : memref<8x32xbf16, #tpu.memory_space<vmem>>, vector<8x8xbf16>
    %cst_45 = arith.constant dense<0.000000e+00> : vector<8x8xf32>
    %72 = tpu.matmul %70, %71, %cst_45 {dimension_numbers = #tpu.dot_dimension_numbers<[1], [1], [0], [0], [0, 0, 1, 0], [], []>} : vector<8x8xbf16>, vector<8x8xbf16>, vector<8x8xf32> -> vector<8x8xf32>
    %73 = vector.extract_strided_slice %18 {offsets = [0, 8], sizes = [8, 8], strides = [1, 1]} : vector<8x32xbf16> to vector<8x8xbf16>
    %c0_46 = arith.constant 0 : index
    %c8_47 = arith.constant 8 : index
    %74 = vector.load %arg16[%c0_46, %c8_47] : memref<8x32xbf16, #tpu.memory_space<vmem>>, vector<8x8xbf16>
    %cst_48 = arith.constant dense<0.000000e+00> : vector<8x8xf32>
    %75 = tpu.matmul %73, %74, %cst_48 {dimension_numbers = #tpu.dot_dimension_numbers<[1], [1], [0], [0], [0, 0, 1, 0], [], []>} : vector<8x8xbf16>, vector<8x8xbf16>, vector<8x8xf32> -> vector<8x8xf32>
    %76 = vector.extract_strided_slice %18 {offsets = [0, 16], sizes = [8, 8], strides = [1, 1]} : vector<8x32xbf16> to vector<8x8xbf16>
    %c0_49 = arith.constant 0 : index
    %c16_50 = arith.constant 16 : index
    %77 = vector.load %arg16[%c0_49, %c16_50] : memref<8x32xbf16, #tpu.memory_space<vmem>>, vector<8x8xbf16>
    %cst_51 = arith.constant dense<0.000000e+00> : vector<8x8xf32>
    %78 = tpu.matmul %76, %77, %cst_51 {dimension_numbers = #tpu.dot_dimension_numbers<[1], [1], [0], [0], [0, 0, 1, 0], [], []>} : vector<8x8xbf16>, vector<8x8xbf16>, vector<8x8xf32> -> vector<8x8xf32>
    %79 = vector.extract_strided_slice %18 {offsets = [0, 24], sizes = [8, 8], strides = [1, 1]} : vector<8x32xbf16> to vector<8x8xbf16>
    %c0_52 = arith.constant 0 : index
    %c24_53 = arith.constant 24 : index
    %80 = vector.load %arg16[%c0_52, %c24_53] : memref<8x32xbf16, #tpu.memory_space<vmem>>, vector<8x8xbf16>
    %cst_54 = arith.constant dense<0.000000e+00> : vector<8x8xf32>
    %81 = tpu.matmul %79, %80, %cst_54 {dimension_numbers = #tpu.dot_dimension_numbers<[1], [1], [0], [0], [0, 0, 1, 0], [], []>} : vector<8x8xbf16>, vector<8x8xbf16>, vector<8x8xf32> -> vector<8x8xf32>
    %82 = arith.maximumf %72, %75 : vector<8x8xf32>
    %83 = arith.maximumf %82, %78 : vector<8x8xf32>
    %84 = arith.maximumf %83, %81 : vector<8x8xf32>
    %85 = arith.subf %72, %84 : vector<8x8xf32>
    %86 = math.exp %85 : vector<8x8xf32>
    %87 = arith.subf %75, %84 : vector<8x8xf32>
    %88 = math.exp %87 : vector<8x8xf32>
    %89 = arith.addf %86, %88 : vector<8x8xf32>
    %90 = arith.subf %78, %84 : vector<8x8xf32>
    %91 = math.exp %90 : vector<8x8xf32>
    %92 = arith.addf %89, %91 : vector<8x8xf32>
    %93 = arith.subf %81, %84 : vector<8x8xf32>
    %94 = math.exp %93 : vector<8x8xf32>
    %95 = arith.addf %92, %94 : vector<8x8xf32>
    %96 = tpu.reciprocal %95 {approx = true} : vector<8x8xf32> -> vector<8x8xf32>
    %97 = arith.mulf %86, %96 : vector<8x8xf32>
    %98 = arith.truncf %97 : vector<8x8xf32> to vector<8x8xbf16>
    %c0_55 = arith.constant 0 : index
    %c0_56 = arith.constant 0 : index
    %c0_57 = arith.constant 0 : index
    %99 = vector.load %arg4[%c0_55, %c0_56, %c0_57] : memref<1x8x32xbf16, #tpu.memory_space<vmem>>, vector<1x8x8xbf16>
    %100 = vector.shape_cast %99 : vector<1x8x8xbf16> to vector<8x8xbf16>
    %cst_58 = arith.constant dense<0.000000e+00> : vector<8x8xf32>
    %101 = tpu.matmul %98, %100, %cst_58 {dimension_numbers = #tpu.dot_dimension_numbers<[1], [0], [0], [1], [0, 0, 1, 1], [], []>} : vector<8x8xbf16>, vector<8x8xbf16>, vector<8x8xf32> -> vector<8x8xf32>
    %102 = arith.mulf %88, %96 : vector<8x8xf32>
    %103 = arith.truncf %102 : vector<8x8xf32> to vector<8x8xbf16>
    %c0_59 = arith.constant 0 : index
    %c0_60 = arith.constant 0 : index
    %c8_61 = arith.constant 8 : index
    %104 = vector.load %arg4[%c0_59, %c0_60, %c8_61] : memref<1x8x32xbf16, #tpu.memory_space<vmem>>, vector<1x8x8xbf16>
    %105 = vector.shape_cast %104 : vector<1x8x8xbf16> to vector<8x8xbf16>
    %cst_62 = arith.constant dense<0.000000e+00> : vector<8x8xf32>
    %106 = tpu.matmul %103, %105, %cst_62 {dimension_numbers = #tpu.dot_dimension_numbers<[1], [0], [0], [1], [0, 0, 1, 1], [], []>} : vector<8x8xbf16>, vector<8x8xbf16>, vector<8x8xf32> -> vector<8x8xf32>
    %107 = arith.mulf %91, %96 : vector<8x8xf32>
    %108 = arith.truncf %107 : vector<8x8xf32> to vector<8x8xbf16>
    %c0_63 = arith.constant 0 : index
    %c0_64 = arith.constant 0 : index
    %c16_65 = arith.constant 16 : index
    %109 = vector.load %arg4[%c0_63, %c0_64, %c16_65] : memref<1x8x32xbf16, #tpu.memory_space<vmem>>, vector<1x8x8xbf16>
    %110 = vector.shape_cast %109 : vector<1x8x8xbf16> to vector<8x8xbf16>
    %cst_66 = arith.constant dense<0.000000e+00> : vector<8x8xf32>
    %111 = tpu.matmul %108, %110, %cst_66 {dimension_numbers = #tpu.dot_dimension_numbers<[1], [0], [0], [1], [0, 0, 1, 1], [], []>} : vector<8x8xbf16>, vector<8x8xbf16>, vector<8x8xf32> -> vector<8x8xf32>
    %112 = arith.mulf %94, %96 : vector<8x8xf32>
    %113 = arith.truncf %112 : vector<8x8xf32> to vector<8x8xbf16>
    %c0_67 = arith.constant 0 : index
    %c0_68 = arith.constant 0 : index
    %c24_69 = arith.constant 24 : index
    %114 = vector.load %arg4[%c0_67, %c0_68, %c24_69] : memref<1x8x32xbf16, #tpu.memory_space<vmem>>, vector<1x8x8xbf16>
    %115 = vector.shape_cast %114 : vector<1x8x8xbf16> to vector<8x8xbf16>
    %cst_70 = arith.constant dense<0.000000e+00> : vector<8x8xf32>
    %116 = tpu.matmul %113, %115, %cst_70 {dimension_numbers = #tpu.dot_dimension_numbers<[1], [0], [0], [1], [0, 0, 1, 1], [], []>} : vector<8x8xbf16>, vector<8x8xbf16>, vector<8x8xf32> -> vector<8x8xf32>
    %117 = tpu.concatenate %101, %106, %111, %116 in 1 : vector<8x8xf32>, vector<8x8xf32>, vector<8x8xf32>, vector<8x8xf32> -> vector<8x32xf32>
    %c0_71 = arith.constant 0 : index
    %c0_72 = arith.constant 0 : index
    %c0_73 = arith.constant 0 : index
    %118 = vector.load %arg15[%c0_71, %c0_72, %c0_73] : memref<1x8x32xf32, #tpu.memory_space<vmem>>, vector<1x8x32xf32>
    %119 = vector.shape_cast %118 : vector<1x8x32xf32> to vector<8x32xf32>
    %120 = vector.shape_cast %117 : vector<8x32xf32> to vector<1x8x32xf32>
    tpu.vector_store %arg15[%c0_71, %c0_72, %c0_73], %120 {strides = array<i32>} : memref<1x8x32xf32, #tpu.memory_space<vmem>>, vector<1x8x32xf32>,
    return
  }
  func.func @transform_0(%arg0: i32, %arg1: i32) -> (i32, i32, i32) {
    %c0_i32 = arith.constant 0 : i32
    %c0_i32_0 = arith.constant 0 : i32
    return %arg0, %arg1, %c0_i32 : i32, i32, i32
  }
  func.func @transform_1(%arg0: i32, %arg1: i32) -> (i32, i32, i32) {
    %c0_i32 = arith.constant 0 : i32
    %c0_i32_0 = arith.constant 0 : i32
    return %arg0, %arg1, %c0_i32 : i32, i32, i32
  }
  func.func @transform_2(%arg0: i32, %arg1: i32) -> (i32, i32, i32) {
    %c0_i32 = arith.constant 0 : i32
    %c0_i32_0 = arith.constant 0 : i32
    %c0_i32_1 = arith.constant 0 : i32
    return %arg0, %c0_i32, %c0_i32_0 : i32, i32, i32
  }
  func.func @transform_3(%arg0: i32, %arg1: i32) -> (i32, i32, i32) {
    %c0_i32 = arith.constant 0 : i32
    %c0_i32_0 = arith.constant 0 : i32
    %c0_i32_1 = arith.constant 0 : i32
    return %arg0, %c0_i32, %c0_i32_0 : i32, i32, i32
  }
  func.func @transform_4(%arg0: i32, %arg1: i32) -> (i32, i32) {
    %c0_i32 = arith.constant 0 : i32
    %c0_i32_0 = arith.constant 0 : i32
    %c0_i32_1 = arith.constant 0 : i32
    return %c0_i32, %c0_i32_0 : i32, i32
  }
  func.func @transform_5(%arg0: i32, %arg1: i32) -> (i32, i32) {
    %c0_i32 = arith.constant 0 : i32
    %c0_i32_0 = arith.constant 0 : i32
    %c0_i32_1 = arith.constant 0 : i32
    return %c0_i32, %c0_i32_0 : i32, i32
  }
  func.func @transform_6(%arg0: i32, %arg1: i32) -> (i32, i32) {
    %c0_i32 = arith.constant 0 : i32
    %c0_i32_0 = arith.constant 0 : i32
    %c0_i32_1 = arith.constant 0 : i32
    return %c0_i32, %c0_i32_0 : i32, i32
  }
  func.func @transform_7(%arg0: i32, %arg1: i32) -> (i32, i32) {
    %c0_i32 = arith.constant 0 : i32
    %c0_i32_0 = arith.constant 0 : i32
    %c0_i32_1 = arith.constant 0 : i32
    return %c0_i32, %c0_i32_0 : i32, i32
  }
  func.func @transform_8(%arg0: i32, %arg1: i32) -> (i32, i32) {
    %c0_i32 = arith.constant 0 : i32
    %c0_i32_0 = arith.constant 0 : i32
    %c0_i32_1 = arith.constant 0 : i32
    return %c0_i32, %c0_i32_0 : i32, i32
  }
  func.func @transform_9(%arg0: i32, %arg1: i32) -> (i32, i32) {
    %c0_i32 = arith.constant 0 : i32
    %c0_i32_0 = arith.constant 0 : i32
    %c0_i32_1 = arith.constant 0 : i32
    return %c0_i32, %c0_i32_0 : i32, i32
  }
  func.func @transform_10(%arg0: i32, %arg1: i32) -> (i32, i32) {
    %c0_i32 = arith.constant 0 : i32
    %c0_i32_0 = arith.constant 0 : i32
    %c0_i32_1 = arith.constant 0 : i32
    return %c0_i32, %c0_i32_0 : i32, i32
  }
  func.func @transform_11(%arg0: i32, %arg1: i32) -> (i32, i32) {
    %c0_i32 = arith.constant 0 : i32
    %c0_i32_0 = arith.constant 0 : i32
    %c0_i32_1 = arith.constant 0 : i32
    return %c0_i32, %c0_i32_0 : i32, i32
  }
  func.func @transform_12(%arg0: i32, %arg1: i32) -> (i32, i32, i32) {
    %c0_i32 = arith.constant 0 : i32
    %c0_i32_0 = arith.constant 0 : i32
    return %arg0, %arg1, %c0_i32 : i32, i32, i32
  }
  func.func @transform_13(%arg0: i32, %arg1: i32) -> (i32, i32, i32) {
    %c0_i32 = arith.constant 0 : i32
    %c0_i32_0 = arith.constant 0 : i32
    return %arg0, %arg1, %c0_i32 : i32, i32, i32
  }
}

</mosaic_0001>

<bundles_post_ra>
// kernel: tpu_custom_call.1
= control target key start
LH: loop header
LB: loop body
LE: loop exit
PB: predicated region body
PF: predicated region fallthrough
CT: control target
= control target key end

     0   :  { %s3471_s0 = inlined_call_operand.hbm [shape: bf16[2,8,32], index: 0, kind: input, shape index: {}]   ;;  %s3472_s1 = inlined_call_operand.hbm [shape: bf16[2,8,32], index: 1, kind: input, shape index: {}]   ;;  %s3473_s2 = inlined_call_operand.hbm [shape: bf16[2,8,32], index: 2, kind: input, shape index: {}]   ;;  %s3474_s3 = inlined_call_operand.hbm [shape: bf16[2,8,32], index: 3, kind: input, shape index: {}]   ;;  %s3475_s4 = inlined_call_operand.hbm [shape: bf16[32,32], index: 4, kind: input, shape index: {}]   ;;  %s3476_s5 = inlined_call_operand.vmem [shape: bf16[32,32], index: 5, kind: input, shape index: {}]   ;;  %s3477_s6 = inlined_call_operand.hbm [shape: bf16[32,32], index: 6, kind: input, shape index: {}]   ;;  %s3478_s7 = inlined_call_operand.hbm [shape: bf16[32,32], index: 7, kind: input, shape index: {}]   ;;  %s3479_s8 = inlined_call_operand.vmem [shape: f32[1,32], index: 8, kind: input, shape index: {}]   ;;  %s3480_s9 = inlined_call_operand.vmem [shape: f32[1,32], index: 9, kind: input, shape index: {}]   ;;  %s3481_s10 = inlined_call_operand.vmem [shape: f32[1,32], index: 10, kind: input, shape index: {}]   ;;  %s3482_s11 = inlined_call_operand.vmem [shape: f32[1,32], index: 11, kind: input, shape index: {}]   ;;  %s3483_s12 = inlined_call_operand.hbm [shape: f32[2,8,32], index: 12, kind: output, shape index: {0}]   ;;  %s3484_s13 = inlined_call_operand.hbm [shape: f32[2,8,32], index: 13, kind: output, shape index: {1}]  }
   0x1   :  { %3507 = sst [smem:[#allocation33_spill]] %s3471_s0 }
   0x2   :  { %3508 = sst [smem:[#allocation34_spill]] %s3472_s1 }
   0x3   :  { %3509 = sst [smem:[#allocation35_spill]] %s3475_s4 }
   0x4   :  { %3510 = sst [smem:[#allocation36_spill]] %s3477_s6 }
   0x5   :  { %3511 = sst [smem:[#allocation37_spill]] %s3479_s8 }
   0x6   :  { %3512 = sst [smem:[#allocation38_spill]] %s3481_s10 }
   0x7   :  { %3513 = sst [smem:[#allocation39_spill]] %s3482_s11 }
   0x8   :  { %3514 = sst [smem:[#allocation40_spill]] %s3483_s12 }
   0x9   :  { %3515 = sst [smem:[#allocation41_spill]] %s3484_s13 }
   0xa   :  { %19 = vsyncpa [#allocation5], 0 }
   0xb   :  { %21 = vsyncpa [#allocation5 + $0x1], 0 }
   0xc   :  { %22 = vsyncpa [#allocation8], 0 }
   0xd   :  { %24 = vsyncpa [#allocation8 + $0x1], 0 }
   0xe   :  { %25 = vsyncpa [#allocation11], 0 }
   0xf   :  { %27 = vsyncpa [#allocation11 + $0x1], 0 }
  0x10   :  { %28 = vsyncpa [#allocation14], 0 }
  0x11   :  { %29 = vsyncpa [#allocation6], 0 }
  0x12   :  { %31 = vsyncpa [#allocation6 + $0x1], 0 }
  0x13   :  { %32 = vsyncpa [#allocation18], 0 }
  0x14   :  { %34 = vsyncpa [#allocation18 + $0x1], 0  ;;  %s2863_s25 = smov 0   ;;  %s2865_s26 = smov 0  }
  0x15   :  { %s2867_s27 = smov 0   ;;  %s2869_s28 = smov 0  }
  0x16   :  { %s2871_s29 = smov 0   ;;  %s2873_s30 = smov 0  }
  0x17 LB: > { %3516 = sst [smem:[#allocation26_spill]] %s2752_s25  ;;  %s2894_s14 = sadd.s32 4294967295, %s2772_s30   ;;  %s2772_s30 = sphi %s2873_s30, %s40_s30   ;;  %s2768_s29 = sphi %s2871_s29, %s3565_s29   ;;  %s2764_s28 = sphi %s2869_s28, %s3564_s28   ;;  %s2760_s27 = sphi %s2867_s27, %s3568_s27   ;;  %s2756_s26 = sphi %s2865_s26, %s3567_s26   ;;  %s2752_s25 = sphi %s2863_s25, %s3566_s25  }
  0x18   : > { %3517 = sst [smem:[#allocation27_spill]] %s2764_s28  ;;  %s2045_s15 = sadd.s32 4294967294, %s2772_s30  }
  0x19   : > { %3518 = sst [smem:[#allocation28_spill]] %s2768_s29  ;;  %p74_p0 = scmp.ne.s32.totalorder %s2756_s26, %s2752_s25 }
  0x1a   : > { %p3489_p1 = scmp.eq.s32.totalorder %s2894_s14, 0  ;;  %p354_p3 = scmp.eq.s32.totalorder %s2045_s15, 1 }
  0x1b   : > { %p2046_p5 = scmp.ge.s32.totalorder %s2772_s30, 1  ;;  %p389_p7 = scmp.lt.s32.totalorder %s2772_s30, 3 }
  0x1c   : > { %p2903_p4 = por %p3489_p1, %p74_p0  ;;  %p2908_p6 = por %p354_p3, %p74_p0 }
  0x1d   : > { %p2913_p8 = pnand %p2046_p5, %p389_p7  ;;  %s2774_s19 = smov [#allocation12]  }
  0x1e   : > { %s3519_s16 = scalar_select %p2903_p4, 1, 0 }
  0x1f   : > { %s3520_s17 = scalar_select %p2908_p6, 1, 0 }
  0x20   : > { %s3522_s18 = scalar_select %p2913_p8, 1, 0 }
  0x21   : > { %3521 = sst [smem:[#allocation29_spill]] %s3520_s17  ;;  %s401_s20 = sshll.u32 %s2774_s19, 4  ;;  %s2917_s20 = int_to_ptr.vmem [resolvable:$true] %s401_s20 }
  0x22   : > { %p2307_p9 = pneg %p2913_p8  ;;  %s2775_s22 = smov [#allocation13]  }
  0x23   : > { %s417_s23 = sshll.u32 %s2775_s22, 4  ;;  %s3524_s4 = sld [smem:[#allocation35_spill]]  ;;  %s2928_s23 = int_to_ptr.vmem [resolvable:$true] %s417_s23 }
  0x24   : > { %p2924_p11 = pnand %p2307_p9, %p3489_p1 }
  0x26   : > { %s3523_s21 = scalar_select %p2924_p11, 1, 0 }
  0x27   : > { %p2938_p13 = pneg %p2924_p11 }
  0x29   : > { %s2438_s17 = scalar_lea.hbm %s3524_s4, 256 }
  0x2a   : > { %p2439_p12 = scmp.ne.s32.totalorder %s3524_s4, %s2438_s17  ;;  %p2445_p5 = scmp.lt.u32.totalorder %s2438_s17, %s3524_s4 }
  0x2b   : > { %s3525_s13 = scalar_select %p2938_p13, 1, 0 }
  0x2c   : > { %p2441_p0 = pnand %p2938_p13, %p2439_p12 }
  0x2e   : > { %p2442_p3 = pneg %p2441_p0 }
  0x30   : > { %p2447_p7 = pnand %p2445_p5, %p2442_p3 }
  0x32   : > { %2450 = shalt.err (!%p2447_p7)
}
  0x33   : > { %s2451_s25 = scalar_lea.vmem %s2917_s20, 256  ;;  %p2459_p2 = scmp.lt.s32.totalorder %s2917_s20, %s2917_s20 }
  0x34   : > { %p2452_p9 = scmp.ne.s32.totalorder %s2917_s20, %s2451_s25  ;;  %p2460_p6 = scmp.lt.s32.totalorder %s2451_s25, %s2451_s25 }
  0x36   : > { %p2454_p10 = pnand %p2452_p9, %p2938_p13  ;;  %p2461_p12 = por %p2460_p6, %p2459_p2 }
  0x38   : > { %p2455_p1 = pneg %p2454_p10 }
  0x3a   : > { %p2462_p0 = pnand %p2461_p12, %p2455_p1 }
  0x3c   : > { %2465 = shalt.err (!%p2462_p0)
}
  0x3d   : > { %s3491_s24 = smov 64   ;;  %s3492_s12 = smov 4  }
  0x3e   : > { %2310 = dma.hbm_to_vmem [thread:$0]  (!%p2924_p11), %s3524_s4, 256, %s2917_s20, [#allocation11], %s3491_s24, %s3491_s24, %s3492_s12  }
  0x3f   : > { %s3526_s6 = sld [smem:[#allocation36_spill]] }
  0x45   : > { %s2466_s25 = scalar_lea.hbm %s3526_s6, 256 }
  0x46   : > { %p2467_p1 = scmp.ne.s32.totalorder %s3526_s6, %s2466_s25  ;;  %p2473_p10 = scmp.lt.u32.totalorder %s2466_s25, %s3526_s6 }
  0x48   : > { %p2469_p2 = pnand %p2467_p1, %p2938_p13 }
  0x4a   : > { %p2470_p6 = pneg %p2469_p2 }
  0x4c   : > { %p2475_p3 = pnand %p2473_p10, %p2470_p6 }
  0x4e   : > { %2478 = shalt.err (!%p2475_p3)
}
  0x4f   : > { %s2479_s20 = scalar_lea.vmem %s2928_s23, 256  ;;  %p2487_p12 = scmp.lt.s32.totalorder %s2928_s23, %s2928_s23 }
  0x50   : > { %p2480_p5 = scmp.ne.s32.totalorder %s2928_s23, %s2479_s20  ;;  %p2488_p0 = scmp.lt.s32.totalorder %s2479_s20, %s2479_s20 }
  0x52   : > { %p2482_p7 = pnand %p2480_p5, %p2938_p13  ;;  %p2489_p1 = por %p2488_p0, %p2487_p12 }
  0x54   : > { %p2483_p9 = pneg %p2482_p7 }
  0x56   : > { %p2490_p2 = pnand %p2489_p1, %p2483_p9 }
  0x58   : > { %2493 = shalt.err (!%p2490_p2)
}
  0x59   : > { %2313 = dma.hbm_to_vmem [thread:$0]  (!%p2924_p11), %s3526_s6, 256, %s2928_s23, [#allocation14], %s3491_s24, %s3491_s24, %s3492_s12  }
  0x5a   : > { %s52_s11 = sadd.s32 1, %s2768_s29  ;;  %s61_s28 = sadd.s32 1, %s2760_s27 }
  0x5b   : > { %p54_p6 = scmp.ge.s32.totalorder %s52_s11, 2  ;;  %p68_p10 = scmp.ne.s32.totalorder %s2760_s27, %s2756_s26 }
  0x5c   : > { %p69_p3 = scmp.eq.s32.totalorder %s2772_s30, 0  ;;  %p2340_p5 = scmp.lt.s32.totalorder %s2772_s30, 2 }
  0x5d   : > { %s3570_s11 = smov (%p54_p6, %s52_s11), 0  ;;  %p3528_p9 = scmp.eq.s32.totalorder %s2894_s14, 1 }
  0x5e   : > { %3527 = sst [smem:[#allocation30_spill]] %s3570_s11  ;;  %p70_p7 = por %p69_p3, %p68_p10 }
  0x5f   : > { %p2998_p12 = por %p3528_p9, %p68_p10  ;;  %s56_s15 = ssub.s32 %s2768_s29, %s3570_s11 }
  0x60   : > { %s3493_s23 = sand.u32 1, %s2760_s27   ;;  %p59_p0 = scmp.eq.s32.totalorder %s56_s15, 0 }
  0x61   : > { %s3529_s17 = scalar_select %p2998_p12, 1, 0 }
  0x62   : > { %s3007_s19 = sshll.u32 %s3493_s23, 2  ;;  %s3010_s22 = sshll.u32 %s2768_s29, 6 }
  0x63   : > { %3530 = sst [smem:[#allocation31_spill]] %s3529_s17  ;;  %p3012_p1 = pnand %p2340_p5, %p70_p7 }
  0x64   : > { %s3017_s20 = scalar_select %p59_p0, %s2760_s27, %s61_s28  }
  0x65   : > { %s3531_s25 = scalar_select %p3012_p1, 1, 0 }
  0x66   : > { %3532 = sst [smem:[#allocation32_spill]] %s3017_s20  ;;  %s3498_s8 = sand.u32 1, %s2772_s30  }
  0x67   : > { %s3533_s1 = sld [smem:[#allocation34_spill]]  ;;  %s479_s15 = scalar_lea.vmem [#allocation7], %s3007_s19 }
  0x68   : > { %s487_s23 = sshll.u32 %s479_s15, 4  ;;  %s3031_s4 = scalar_lea.sflag [#allocation8], %s3498_s8  ;;  %s3027_s23 = int_to_ptr.vmem [resolvable:$true] %s487_s23 }
  0x69   : > { %p3037_p6 = pneg %p3012_p1 }
  0x6d   : > { %s3024_s12 = scalar_lea.hbm %s3533_s1, %s3010_s22  ;;  %s2499_s15 = scalar_lea.hbm %s3533_s1, 128 }
  0x6e   : > { %s2494_s6 = scalar_lea.hbm %s3024_s12, 64  ;;  %p2500_p5 = scmp.lt.u32.totalorder %s3024_s12, %s3533_s1 }
  0x6f   : > { %p2495_p2 = scmp.ne.s32.totalorder %s3024_s12, %s2494_s6  ;;  %p2501_p7 = scmp.lt.u32.totalorder %s2499_s15, %s2494_s6 }
  0x70   : > { %p2503_p0 = scmp.lt.u32.totalorder %s2494_s6, %s3024_s12 }
  0x71   : > { %p2497_p10 = pnand %p3037_p6, %p2495_p2  ;;  %p2502_p9 = por %p2501_p7, %p2500_p5 }
  0x73   : > { %p2498_p3 = pneg %p2497_p10  ;;  %p2504_p12 = por %p2503_p0, %p2502_p9 }
  0x75   : > { %p2505_p4 = pnand %p2504_p12, %p2498_p3 }
  0x77   : > { %2508 = shalt.err (!%p2505_p4)
}
  0x78   : > { %s2509_s8 = scalar_lea.vmem %s3027_s23, 64  ;;  %s2778_s24 = smov [#allocation7]  }
  0x79   : > { %p2510_p2 = scmp.ne.s32.totalorder %s3027_s23, %s2509_s8  ;;  %s2514_s10 = sshll.u32 %s2778_s24, 4  ;;  %s2515_s10 = int_to_ptr.vmem [resolvable:$false] %s2514_s10 }
  0x7a   : > { %s2516_s29 = scalar_lea.vmem %s2515_s10, 128  ;;  %p2517_p11 = scmp.lt.s32.totalorder %s3027_s23, %s2515_s10 }
  0x7b   : > { %p2512_p10 = pnand %p2510_p2, %p3037_p6  ;;  %p2518_p13 = scmp.lt.s32.totalorder %s2516_s29, %s2509_s8 }
  0x7d   : > { %p2513_p8 = pneg %p2512_p10  ;;  %p2519_p5 = por %p2518_p13, %p2517_p11 }
  0x7f   : > { %p2520_p7 = pnand %p2519_p5, %p2513_p8 }
  0x81   : > { %2523 = shalt.err (!%p2520_p7)
}
  0x82   : > { %2323 = dma.hbm_to_vmem [thread:$0]  (!%p3012_p1), %s3024_s12, 64, %s3027_s23, %s3031_s4  }
  0x83   : > { %s2779_s6 = smov [#allocation15]   ;;  %s3535_s0 = sld [smem:[#allocation33_spill]] }
  0x84   : > { %s430_s11 = sshll.u32 %s2779_s6, 4  ;;  %s2524_s29 = scalar_lea.hbm %s3478_s7, 256  ;;  %s431_s11 = int_to_ptr.vmem [resolvable:$true] %s430_s11 }
  0x85   : > { %p2525_p4 = scmp.ne.s32.totalorder %s3478_s7, %s2524_s29  ;;  %p3536_p8 = scmp.ne.s32.totalorder %s3525_s13, 0 }
  0x86   : > { %p2531_p12 = scmp.lt.u32.totalorder %s2524_s29, %s3478_s7 }
  0x87   : > { %p2527_p11 = pnand %p2525_p4, %p3536_p8 }
  0x89   : > { %s3065_s1 = scalar_lea.hbm %s3535_s0, %s3010_s22  ;;  %p2528_p13 = pneg %p2527_p11 }
  0x8b   : > { %p2533_p3 = pnand %p2531_p12, %p2528_p13 }
  0x8d   : > { %2536 = shalt.err (!%p2533_p3)
}
  0x8e   : > { %s2537_s6 = scalar_lea.vmem %s431_s11, 256  ;;  %p2545_p10 = scmp.lt.s32.totalorder %s431_s11, %s431_s11 }
  0x8f   : > { %p2538_p9 = scmp.ne.s32.totalorder %s431_s11, %s2537_s6  ;;  %p2546_p5 = scmp.lt.s32.totalorder %s2537_s6, %s2537_s6 }
  0x91   : > { %p2540_p0 = pnand %p2538_p9, %p3536_p8  ;;  %p2547_p7 = por %p2546_p5, %p2545_p10 }
  0x93   : > { %p2541_p2 = pneg %p2540_p0 }
  0x95   : > { %p2548_p1 = pnand %p2547_p7, %p2541_p2 }
  0x97   : > { %2551 = shalt.err (!%p2548_p1)
}
  0x98   : > { %p3537_p4 = scmp.ne.s32.totalorder %s3523_s21, 0  ;;  %s3538_s17 = smov 4  }
  0x99   : > { %s3539_s20 = smov 64   ;;  %s460_s13 = scalar_lea.vmem [#allocation4], %s3007_s19 }
  0x9a   : > { %2316 = dma.hbm_to_vmem [thread:$0]  (!%p3537_p4), %s3478_s7, 256, %s431_s11, [#allocation14], %s3539_s20, %s3539_s20, %s3538_s17  }
  0x9b   : > { %s468_s8 = sshll.u32 %s460_s13, 4  ;;  %s3095_s29 = scalar_lea.hbm %s3473_s2, %s3010_s22  ;;  %s3089_s8 = int_to_ptr.vmem [resolvable:$true] %s468_s8 }
  0x9c   : > { %s3540_s12 = sand.u32 1, %s2760_s27   ;;  %s2552_s6 = scalar_lea.hbm %s3065_s1, 64 }
  0x9d   : > { %s457_s23 = scalar_lea.sflag [#allocation5], %s3540_s12  ;;  %p2553_p1 = scmp.ne.s32.totalorder %s3065_s1, %s2552_s6 }
  0x9e   : > { %s2557_s11 = scalar_lea.hbm %s3535_s0, 128  ;;  %p2558_p13 = scmp.lt.u32.totalorder %s3065_s1, %s3535_s0 }
  0x9f   : > { %p2555_p8 = pnand %p2553_p1, %p3037_p6  ;;  %p2559_p12 = scmp.lt.u32.totalorder %s2557_s11, %s2552_s6 }
  0xa0   : > { %p2561_p9 = scmp.lt.u32.totalorder %s2552_s6, %s3065_s1 }
  0xa1   : > { %p2556_p11 = pneg %p2555_p8  ;;  %p2560_p3 = por %p2559_p12, %p2558_p13 }
  0xa3   : > { %p2562_p0 = por %p2561_p9, %p2560_p3 }
  0xa5   : > { %p2563_p2 = pnand %p2562_p0, %p2556_p11 }
  0xa7   : > { %2566 = shalt.err (!%p2563_p2)
}
  0xa8   : > { %s2567_s13 = scalar_lea.vmem %s3089_s8, 64  ;;  %s2780_s21 = smov [#allocation4]  }
  0xa9   : > { %p2568_p10 = scmp.ne.s32.totalorder %s3089_s8, %s2567_s13  ;;  %s2572_s10 = sshll.u32 %s2780_s21, 4  ;;  %s2573_s10 = int_to_ptr.vmem [resolvable:$false] %s2572_s10 }
  0xaa   : > { %s2574_s12 = scalar_lea.vmem %s2573_s10, 128  ;;  %p2575_p4 = scmp.lt.s32.totalorder %s3089_s8, %s2573_s10 }
  0xab   : > { %p2570_p5 = pnand %p2568_p10, %p3037_p6  ;;  %p2576_p1 = scmp.lt.s32.totalorder %s2574_s12, %s2567_s13 }
  0xad   : > { %p2571_p7 = pneg %p2570_p5  ;;  %p2577_p8 = por %p2576_p1, %p2575_p4 }
  0xaf   : > { %p2578_p13 = pnand %p2577_p8, %p2571_p7 }
  0xb1   : > { %2581 = shalt.err (!%p2578_p13)
}
  0xb2   : > { %p3541_p11 = scmp.ne.s32.totalorder %s3531_s25, 0  ;;  %s498_s6 = scalar_lea.vmem [#allocation9], %s3007_s19 }
  0xb3   : > { %s505_s15 = sshll.u32 %s498_s6, 4  ;;  %s3125_s17 = scalar_lea.hbm %s3474_s3, %s3010_s22  ;;  %s506_s15 = int_to_ptr.vmem [resolvable:$true] %s505_s15 }
  0xb4   : > { %2320 = dma.hbm_to_vmem [thread:$0]  (!%p3541_p11), %s3065_s1, 64, %s3089_s8, %s457_s23  }
  0xb5   : > { %s2582_s20 = scalar_lea.hbm %s3095_s29, 64  ;;  %s2587_s10 = scalar_lea.hbm %s3473_s2, 128 }
  0xb6   : > { %p2583_p12 = scmp.ne.s32.totalorder %s3095_s29, %s2582_s20  ;;  %p2588_p0 = scmp.lt.u32.totalorder %s3095_s29, %s3473_s2 }
  0xb7   : > { %p2589_p2 = scmp.lt.u32.totalorder %s2587_s10, %s2582_s20  ;;  %p2591_p5 = scmp.lt.u32.totalorder %s2582_s20, %s3095_s29 }
  0xb8   : > { %p2585_p3 = pnand %p2583_p12, %p3037_p6 }
  0xb9   : > { %p2590_p10 = por %p2589_p2, %p2588_p0 }
  0xba   : > { %p2586_p9 = pneg %p2585_p3 }
  0xbb   : > { %p2592_p7 = por %p2591_p5, %p2590_p10 }
  0xbd   : > { %p2593_p4 = pnand %p2592_p7, %p2586_p9 }
  0xbf   : > { %2596 = shalt.err (!%p2593_p4)
}
  0xc0   : > { %s2597_s1 = scalar_lea.vmem %s506_s15, 64  ;;  %s2781_s22 = smov [#allocation9]  }
  0xc1   : > { %p2598_p1 = scmp.ne.s32.totalorder %s506_s15, %s2597_s1  ;;  %s2602_s8 = sshll.u32 %s2781_s22, 4  ;;  %s2603_s8 = int_to_ptr.vmem [resolvable:$false] %s2602_s8 }
  0xc2   : > { %s2604_s23 = scalar_lea.vmem %s2603_s8, 128  ;;  %p2605_p12 = scmp.lt.s32.totalorder %s506_s15, %s2603_s8 }
  0xc3   : > { %p2600_p8 = pnand %p2598_p1, %p3037_p6  ;;  %p2606_p3 = scmp.lt.s32.totalorder %s2604_s23, %s2597_s1 }
  0xc5   : > { %p2601_p13 = pneg %p2600_p8  ;;  %p2607_p11 = por %p2606_p3, %p2605_p12 }
  0xc7   : > { %p2608_p0 = pnand %p2607_p11, %p2601_p13 }
  0xc9   : > { %2611 = shalt.err (!%p2608_p0)
}
  0xca   : > { %p3542_p2 = scmp.ne.s32.totalorder %s3531_s25, 0  ;;  %s516_s0 = scalar_lea.vmem [#allocation10], %s3007_s19 }
  0xcb   : > { %s523_s6 = sshll.u32 %s516_s0, 4  ;;  %s3543_s24 = sand.u32 1, %s2772_s30   ;;  %s524_s6 = int_to_ptr.vmem [resolvable:$true] %s523_s6 }
  0xcc   : > { %2326 = dma.hbm_to_vmem [thread:$0]  (!%p3542_p2), %s3095_s29, 64, %s506_s15, %s3031_s4  }
  0xcd   : > { %s513_s11 = scalar_lea.sflag [#allocation11], %s3543_s24  ;;  %s2612_s20 = scalar_lea.hbm %s3125_s17, 64 }
  0xce   : > { %p2613_p11 = scmp.ne.s32.totalorder %s3125_s17, %s2612_s20  ;;  %s2617_s10 = scalar_lea.hbm %s3474_s3, 128 }
  0xcf   : > { %p2618_p5 = scmp.lt.u32.totalorder %s3125_s17, %s3474_s3  ;;  %p2619_p7 = scmp.lt.u32.totalorder %s2617_s10, %s2612_s20 }
  0xd0   : > { %p2615_p9 = pnand %p2613_p11, %p3037_p6  ;;  %p2621_p1 = scmp.lt.u32.totalorder %s2612_s20, %s3125_s17 }
  0xd1   : > { %p2620_p4 = por %p2619_p7, %p2618_p5 }
  0xd2   : > { %p2616_p10 = pneg %p2615_p9 }
  0xd3   : > { %p2622_p8 = por %p2621_p1, %p2620_p4 }
  0xd5   : > { %p2623_p13 = pnand %p2622_p8, %p2616_p10 }
  0xd7   : > { %2626 = shalt.err (!%p2623_p13)
}
  0xd8   : > { %s2627_s4 = scalar_lea.vmem %s524_s6, 64  ;;  %s2782_s19 = smov [#allocation10]  }
  0xd9   : > { %p2628_p12 = scmp.ne.s32.totalorder %s524_s6, %s2627_s4  ;;  %s2632_s29 = sshll.u32 %s2782_s19, 4  ;;  %s2633_s29 = int_to_ptr.vmem [resolvable:$false] %s2632_s29 }
  0xda   : > { %s2634_s15 = scalar_lea.vmem %s2633_s29, 128  ;;  %p2635_p11 = scmp.lt.s32.totalorder %s524_s6, %s2633_s29 }
  0xdb   : > { %p2630_p3 = pnand %p2628_p12, %p3037_p6  ;;  %p2636_p9 = scmp.lt.s32.totalorder %s2634_s15, %s2627_s4 }
  0xdd   : > { %p2631_p0 = pneg %p2630_p3  ;;  %p2637_p2 = por %p2636_p9, %p2635_p11 }
  0xdf   : > { %p2638_p5 = pnand %p2637_p2, %p2631_p0 }
  0xe1   : > { %2641 = shalt.err (!%p2638_p5)
}
  0xe2   : > { %p3544_p7 = scmp.ne.s32.totalorder %s3531_s25, 0  ;;  %p3545_p10 = scmp.ne.s32.totalorder %s3522_s18, 0 }
  0xe3   : > { %s3168_s28 = sand.u32 (!%p3545_p10), 1, %s2756_s26   ;;  %p3546_p6 = scmp.ne.s32.totalorder (!%p3545_p10), %s3519_s16, 0 }
  0xe4   : > { %2329 = dma.hbm_to_vmem [thread:$0]  (!%p3544_p7), %s3125_s17, 64, %s524_s6, %s513_s11  }
  0xe5   : > { %532 = sbr.rel (%p3545_p10) target bundleno = 1507 (0x5e3), region = 68  ;;  %s3171_s22 = sshll.u32 (!%p3545_p10), %s3168_s28, 2 }
  0xe6   : > { %s535_s8 = scalar_lea.sflag (!%p3545_p10), [#allocation5], %s3168_s28  ;;  %s538_s23 = scalar_lea.vmem (!%p3545_p10), [#allocation4], %s3171_s22 }
  0xec   : > { %2723 = dma.done.wait (%p3546_p6), %s535_s8, 64  }
  0xed   : > { %2725 = vsyncadd (%p3546_p6), %s535_s8, 4294967232  ;;  %s543_s18 = sand.u32 1, %s2894_s14   ;;  %s547_s17 = scalar_lea.vmem [#allocation7], %s3171_s22 }
  0xee   : > { %s544_s25 = scalar_lea.sflag [#allocation8], %s543_s18 }
  0xef   : > { %2727 = dma.done.wait (%p3546_p6), %s544_s25, 128  }
  0xf0   : > { %2729 = vsyncadd (%p3546_p6), %s544_s25, 4294967168  ;;  %s556_s0 = scalar_lea.vmem [#allocation9], %s3171_s22  ;;  %s562_s6 = scalar_lea.sflag [#allocation11], %s543_s18 }
  0xf1   : > { %s565_s24 = scalar_lea.vmem [#allocation10], %s3171_s22 }
  0xf2   : > { %2731 = dma.done.wait (%p3546_p6), %s562_s6, 64  }
  0xf3   : > { %2733 = vsyncadd (%p3546_p6), %s562_s6, 4294967232  ;;  %p3547_p2 = scmp.eq.s32.totalorder %s2894_s14, 0 }
  0xf5   : > { %2735 = dma.done.wait (%p3547_p2), [#allocation11], 256   ;;  %p3548_p4 = pmov %p3547_p2 }
  0xf6   : > { %p3549_p1 = pmov %p3547_p2 }
  0xf7   : > { %2737 = vsyncadd (%p3548_p4), [#allocation11], 4294967040 }
  0xf8   : > { %2739 = dma.done.wait (%p3549_p1), [#allocation14], 512   ;;  %p3550_p8 = pmov %p3549_p1 }
  0xf9   : > { %v2783_v0 = vmov 0.0   ;;  %vm2784_vm0 = vmmov 0   ;;  %v2406_v1 = vld [vmem:[%s3476_s5] sm:$0xff]   ;;  %v2407_v2 = vld [vmem:[#allocation15] sm:$0xff]   ;;  %v2408_v3 = vld [vmem:[%s3476_s5 + $0x8] sm:$0xff]   ;;  %vm669_vm1 = vcmask 261120  }
  0xfa   : > { %2741 = vsyncadd (%p3550_p8), [#allocation14], 4294966784  ;;  %2155 = vmatprep.subr.bf16.mxu0 %v2783_v0  ;;  %2163 = vmatprep.subr.bf16.mxu1 %v2783_v0  ;;  %v2409_v4 = vld [vmem:[#allocation15 + $0x8] sm:$0xff]   ;;  %v645_v5 = vld [vmem:[%s556_s0] sm:$0xf]  ;;  %s3551_s1 = sld [smem:[#allocation39_spill]] }
  0xfb   : > { %2159 = vmatprep.mubr.msk.bf16.mxu0 %vm2784_vm0, %v2783_v0  ;;  %2167 = vmatprep.mubr.msk.bf16.mxu1 %vm2784_vm0, %v2783_v0  ;;  %v2410_v6 = vld [vmem:[#allocation12] sm:$0xff]   ;;  %v716_v7 = vld [vmem:[%s565_s24] sm:$0xf]  ;;  %v2411_v8 = vld [vmem:[#allocation12 + $0x8] sm:$0xff]   ;;  %vm714_vm2 = vcmask 257024   ;;  %s3552_s29 = sld [smem:[#allocation37_spill]] }
  0xfc   : > { %2156 = vmatpush3.bf16.msra.mxu0 %v2406_v1  ;;  %2164 = vmatpush3.bf16.msra.mxu1 %v2407_v2  ;;  %v785_v9 = vld [vmem:[%s538_s23] sm:$0xf]  ;;  %v2415_v10 = vld [vmem:[#allocation13] sm:$0xff]   ;;  %v2416_v11 = vld [vmem:[#allocation13 + $0x8] sm:$0xff]   ;;  %vm923_vm3 = vcmask 64512   ;;  %s2785_s15 = smov 120  }
  0xfd   : > { %2157 = vmatprep.subr.bf16.mxu0 %v2783_v0  ;;  %2165 = vmatprep.subr.bf16.mxu1 %v2783_v0  ;;  %v854_v12 = vld [vmem:[%s547_s17] sm:$0xf]  ;;  %s2786_s8 = smov 104   ;;  %v1145_v37 = vld [vmem:[%s565_s24] sm:$0xf]  ;;  %s2787_s23 = smov 112  }
  0xfe   : > { %v2069_v13 = vld [vmem:[%s3480_s9] ss:$0 sm:$0xff]  ;;  %v2091_v38 = vcombine.low %v1145_v37, %v1145_v37  ;;  %s3553_s17 = sld [smem:[#allocation38_spill]]  ;;  %vm1149_vm4 = vcmask 1043456   ;;  %v3303_v1 = vld [vmem:[%s556_s0] sm:$0xf] }
  0xff   : > { %v1151_v63 = vsel %vm1149_vm4, %v1145_v37, 0  ;;  %v2101_v2 = vcombine.low %v3303_v1, %v3303_v1  ;;  %s2788_s22 = smov 8   ;;  %s2789_s0 = smov 16   ;;  %vm1359_vm5 = vcmask 130048   ;;  %vm1361_vm6 = vcmask 195584  }
 0x100   : > { %2158 = vmatpush3.bf16.msra.mxu0 %v2408_v3  ;;  %2166 = vmatpush3.bf16.msra.mxu1 %v2409_v4  ;;  %v2073_v14 = vld [vmem:[%s3551_s1] ss:$0 sm:$0xff]  ;;  %s2790_s6 = smov 24   ;;  %s3554_s24 = sld [smem:[#allocation27_spill]] }
 0x101   : > { %2171 = vmatprep.subr.bf16.mxu0 %v2783_v0  ;;  %2179 = vmatprep.subr.bf16.mxu1 %v2783_v0  ;;  %v2077_v27 = vld [vmem:[%s3552_s29] ss:$0 sm:$0xff]  ;;  %s2067_s16 = sshll.u32 %s3168_s28, 3  ;;  %s3555_s14 = sld [smem:[#allocation31_spill]] }
 0x102   : > { %s632_s11 = scalar_lea.vmem [#allocation16], %s2067_s16  ;;  %s3556_s10 = sld [smem:[#allocation40_spill]] }
 0x103   : > { %2160 = vmatmul.mubr.msk.bf16.vlgmr.msra.gmra.mrb[0].mxu0 %vm669_vm1, %v645_v5  ;;  %2168 = vmatmul.mubr.msk.bf16.vlgmr.msra.gmra.mrb[0].mxu1 %vm669_vm1, %v716_v7  ;;  %s1822_s1 = sshll.u32 %s632_s11, 4  ;;  %s1803_s4 = scalar_lea.sflag [#allocation6], %s3168_s28  ;;  %s3385_s1 = int_to_ptr.vmem [resolvable:$true] %s1822_s1 }
 0x104   : > { %2172 = vmatpush3.bf16.msra.mxu0 %v2410_v6  ;;  %2175 = vmatprep.mubr.msk.bf16.mxu0 %vm2784_vm0, %v2783_v0  ;;  %v2081_v43 = vld [vmem:[%s3553_s17] ss:$0 sm:$0xff]  ;;  %s2642_s19 = scalar_lea.vmem %s3385_s1, 128  ;;  %s2791_s29 = smov [#allocation16]  }
 0x105   : > { %2173 = vmatprep.subr.bf16.mxu0 %v2783_v0  ;;  %2183 = vmatprep.mubr.msk.bf16.mxu1 %vm2784_vm0, %v2783_v0  ;;  %p2643_p13 = scmp.ne.s32.totalorder %s3385_s1, %s2642_s19 }
 0x106   : > { %2180 = vmatpush3.bf16.msra.mxu1 %v2415_v10  ;;  %s2107_s20 = sshll.u32 %s3554_s24, 7 }
 0x107   : > { %2181 = vmatprep.subr.bf16.mxu1 %v2783_v0  ;;  %p3557_p12 = scmp.ne.s32.totalorder %s3555_s14, 0 }
 0x108   : > { %2174 = vmatpush3.bf16.msra.mxu0 %v2411_v8  ;;  %s3383_s12 = scalar_lea.hbm %s3556_s10, %s2107_s20 }
 0x109   : > { %2187 = vmatprep.subr.bf16.mxu0 %v2783_v0  ;;  %p2644_p3 = pnand %p2643_p13, %p3557_p12 }
 0x10a   : > { %2182 = vmatpush3.bf16.msra.mxu1 %v2416_v11 }
 0x10b   : > { %2176 = vmatmul.mubr.msk.bf16.vlgmr.msra.gmra.mrb[4].mxu0 %vm669_vm1, %v785_v9  ;;  %2193 = vmatprep.subr.bf16.mxu1 %v2783_v0  ;;  %p2645_p0 = pneg %p2644_p3 }
 0x10c   : > { %2189 = vmatprep.mubr.msk.bf16.mxu0 %vm2784_vm0, %v2783_v0 }
 0x10d   : > { %2184 = vmatmul.mubr.msk.bf16.vlgmr.msra.gmra.mrb[4].mxu1 %vm669_vm1, %v854_v12 }
 0x10e   : > { %2195 = vmatprep.mubr.msk.bf16.mxu1 %vm2784_vm0, %v2783_v0 }
 0x1d6   : > { %v707_v15 = vpop.f32.mrb[0].mxu0  ;;  %v777_v16 = vpop.f32.mrb[0].mxu1 }
 0x1d7   : > { %v708_v17 = vadd.f32 %v2069_v13, %v707_v15  ;;  %v2161_v18 = vpop.f32.mrb[1].mxu0  ;;  %v778_v19 = vadd.f32 %v2073_v14, %v777_v16  ;;  %v2169_v20 = vpop.f32.mrb[1].mxu1 }
 0x1d8   : > { %v710_v21 = vpop.f32.mrb[2].mxu0  ;;  %v780_v22 = vpop.f32.mrb[2].mxu1 }
 0x1d9   : > { %v713_v23 = vpack.c.bf16 %v708_v17, %v708_v17  ;;  %v2162_v24 = vpop.f32.mrb[3].mxu0  ;;  %v783_v25 = vpack.c.bf16 %v778_v19, %v778_v19  ;;  %v2170_v26 = vpop.f32.mrb[3].mxu1 }
 0x1db   : > { %715 = vst.msk [vmem:[#allocation2] sm:$0xf] %vm714_vm2, %v713_v23  ;;  %784 = vst.msk [vmem:[#allocation3] sm:$0xf] %vm714_vm2, %v783_v25 }
 0x1de   : > { %v847_v28 = vpop.f32.mrb[4].mxu0 }
 0x1df   : > { %v848_v29 = vadd.f32 %v2077_v27, %v847_v28  ;;  %v2177_v30 = vpop.f32.mrb[5].mxu0 }
 0x1e0   : > { %v850_v31 = vpop.f32.mrb[6].mxu0  ;;  %v915_v45 = vpop.f32.mrb[4].mxu1 }
 0x1e1   : > { %v853_v32 = vpack.c.bf16 %v848_v29, %v848_v29  ;;  %v2178_v33 = vpop.f32.mrb[7].mxu0  ;;  %v916_v46 = vadd.f32 %v2081_v43, %v915_v45  ;;  %v2185_v47 = vpop.f32.mrb[5].mxu1 }
 0x1e2   : > { %v922_v34 = vld [vmem:[#allocation3] sm:$0xf]  ;;  %v3261_v39 = vld [vmem:[#allocation2] sm:$0xf]  ;;  %v918_v49 = vpop.f32.mrb[6].mxu1 }
 0x1e3   : > { %971 = vrot.lane.b32.xlu1 %v853_v32, %s2785_s15  ;;  %v928_v35 = vsel %vm923_vm3, %v922_v34, 0  ;;  %v2086_v36 = vcombine.low %v922_v34, %v922_v34  ;;  %v2096_v40 = vcombine.low %v3261_v39, %v3261_v39  ;;  %v3277_v51 = vpack.c.bf16 %v916_v46, %v916_v46  ;;  %v2186_v52 = vpop.f32.mrb[7].mxu1 }
 0x1e4   : > { %2188 = vmatpush3.bf16.xpose.msra.mxu0 %v928_v35 }
 0x1e5   : > { %976 = vrot.lane.b32.xlu0 %v2086_v36, %s2785_s15  ;;  %2199 = vmatprep.subr.bf16.mxu0 %v2783_v0 }
 0x1e7   : > { %1076 = vrot.lane.b32.xlu1 %v2086_v36, %s2786_s8 }
 0x1e9   : > { %1026 = vrot.lane.b32.xlu0 %v2086_v36, %s2787_s23 }
 0x1eb   : > { %1074 = vrot.lane.b32.xlu1 %v853_v32, %s2786_s8  ;;  %2190 = vmatmul.mubr.msk.bf16.vlgmr.msra.gmra.mrb[8].mxu0 %vm923_vm3, %v853_v32 }
 0x1ec   : > { %2201 = vmatprep.mubr.msk.bf16.mxu0 %vm2784_vm0, %v2783_v0 }
 0x1ed   : > { %1024 = vrot.lane.b32.xlu0 %v853_v32, %s2787_s23 }
 0x1ef   : > { %1248 = vrot.lane.b32.xlu1 %v2091_v38, %s2787_s23 }
 0x1f1   : > { %1198 = vrot.lane.b32.xlu0 %v2091_v38, %s2785_s15 }
 0x1f3   : > { %1417 = vrot.lane.b32.xlu1 %v2096_v40, %s2785_s15 }
 0x1f5   : > { %1298 = vrot.lane.b32.xlu0 %v2091_v38, %s2786_s8 }
 0x1f7   : > { %1412 = vrot.lane.b32.xlu1 %v3277_v51, %s2785_s15 }
 0x1f9   : > { %1467 = vrot.lane.b32.xlu0 %v2096_v40, %s2787_s23 }
 0x1fb   : > { %1465 = vrot.lane.b32.xlu1 %v3277_v51, %s2787_s23 }
 0x1fd   : > { %1517 = vrot.lane.b32.xlu0 %v2096_v40, %s2786_s8 }
 0x1ff   : > { %1638 = vrot.lane.b32.xlu1 %v2101_v2, %s2785_s15  ;;  %s2646_s15 = sshll.u32 %s2791_s29, 4  ;;  %s2647_s15 = int_to_ptr.vmem [resolvable:$false] %s2646_s15 }
 0x200   : > { %p2649_p11 = scmp.lt.s32.totalorder %s3385_s1, %s2647_s15 }
 0x201   : > { %1515 = vrot.lane.b32.xlu0 %v3277_v51, %s2786_s8 }
 0x203   : > { %1738 = vrot.lane.b32.xlu1 %v2101_v2, %s2786_s8  ;;  %s2648_s8 = scalar_lea.vmem %s2647_s15, 256 }
 0x204   : > { %p2650_p9 = scmp.lt.s32.totalorder %s2648_s8, %s2642_s19 }
 0x205   : > { %1688 = vrot.lane.b32.xlu0 %v2101_v2, %s2787_s23 }
 0x206   : > { %p2651_p5 = por %p2650_p9, %p2649_p11 }
 0x208   : > { %p2652_p7 = pnand %p2651_p5, %p2645_p0 }
 0x255   : > { %v972_v41 = vpop.permute.xlu1 %971 }
 0x257   : > { %v977_v42 = vpop.permute.xlu0 %976 }
 0x258   : > { %v982_v44 = vsel %vm923_vm3, %v977_v42, 0 }
 0x259   : > { %2194 = vmatpush3.bf16.xpose.msra.mxu1 %v982_v44  ;;  %v1077_v53 = vpop.permute.xlu1 %1076 }
 0x25a   : > { %2205 = vmatprep.subr.bf16.mxu1 %v2783_v0  ;;  %v1082_v55 = vsel %vm923_vm3, %v1077_v53, 0 }
 0x25b   : > { %v1027_v48 = vpop.permute.xlu0 %1026 }
 0x25c   : > { %v1032_v50 = vsel %vm923_vm3, %v1027_v48, 0 }
 0x25d   : > { %2200 = vmatpush3.bf16.xpose.msra.mxu0 %v1032_v50  ;;  %v1075_v58 = vpop.permute.xlu1 %1074  ;;  %v1369_v50 = vsel %vm923_vm3, %v3261_v39, 0 }
 0x25e   : > { %2211 = vmatprep.subr.bf16.mxu0 %v2783_v0 }
 0x25f   : > { %v1025_v54 = vpop.permute.xlu0 %1024 }
 0x260   : > { %2196 = vmatmul.mubr.msk.bf16.vlgmr.msra.gmra.mrb[8].mxu1 %vm923_vm3, %v972_v41 }
 0x261   : > { %2206 = vmatpush3.bf16.xpose.msra.mxu1 %v1082_v55  ;;  %2207 = vmatprep.mubr.msk.bf16.mxu1 %vm2784_vm0, %v2783_v0  ;;  %v1249_v38 = vpop.permute.xlu1 %1248 }
 0x262   : > { %2217 = vmatprep.subr.bf16.mxu1 %v2783_v0  ;;  %v1254_v41 = vsel %vm1149_vm4, %v1249_v38, 0 }
 0x263   : > { %v1199_v56 = vpop.permute.xlu0 %1198 }
 0x264   : > { %2202 = vmatmul.mubr.msk.bf16.vlgmr.msra.gmra.mrb[12].mxu0 %vm923_vm3, %v1025_v54  ;;  %v1204_v57 = vsel %vm1149_vm4, %v1199_v56, 0 }
 0x265   : > { %2213 = vmatprep.mubr.msk.bf16.mxu0 %vm2784_vm0, %v2783_v0  ;;  %2212 = vmatpush3.bf16.msra.mxu0 %v1151_v63  ;;  %v1418_v45 = vpop.permute.xlu1 %1417 }
 0x266   : > { %2223 = vmatprep.subr.bf16.mxu0 %v2783_v0  ;;  %v1423_v49 = vsel %vm923_vm3, %v1418_v45, 0 }
 0x267   : > { %v1299_v40 = vpop.permute.xlu0 %1298 }
 0x268   : > { %2208 = vmatmul.mubr.msk.bf16.vlgmr.msra.gmra.mrb[12].mxu1 %vm923_vm3, %v1075_v58  ;;  %v1304_v42 = vsel %vm1149_vm4, %v1299_v40, 0 }
 0x269   : > { %2218 = vmatpush3.bf16.msra.mxu1 %v1204_v57  ;;  %2219 = vmatprep.mubr.msk.bf16.mxu1 %vm2784_vm0, %v2783_v0  ;;  %v1413_v53 = vpop.permute.xlu1 %1412 }
 0x26a   : > { %2229 = vmatprep.subr.bf16.mxu1 %v2783_v0 }
 0x26b   : > { %v1468_v48 = vpop.permute.xlu0 %1467 }
 0x26c   : > { %v1473_v54 = vsel %vm923_vm3, %v1468_v48, 0 }
 0x26d   : > { %v1466_v56 = vpop.permute.xlu1 %1465 }
 0x26f   : > { %v1518_v52 = vpop.permute.xlu0 %1517 }
 0x270   : > { %v1523_v55 = vsel %vm923_vm3, %v1518_v52, 0 }
 0x271   : > { %v1639_v57 = vpop.permute.xlu1 %1638 }
 0x272   : > { %v1644_v58 = vsel %vm1149_vm4, %v1639_v57, 0 }
 0x273   : > { %v1516_v39 = vpop.permute.xlu0 %1515 }
 0x277   : > { %v1689_v48 = vpop.permute.xlu0 %1688 }
 0x2be   : > { %v964_v59 = vpop.f32.mrb[8].mxu0 }
 0x2bf   : > { %v2191_v60 = vpop.f32.mrb[9].mxu0 }
 0x2c0   : > { %v967_v61 = vpop.f32.mrb[10].mxu0 }
 0x2c1   : > { %v2192_v62 = vpop.f32.mrb[11].mxu0 }
 0x333   : > { %v1018_v3 = vpop.f32.mrb[8].mxu1 }
 0x334   : > { %v1124_v4 = vmax.f32 %v964_v59, %v1018_v3  ;;  %v2197_v5 = vpop.f32.mrb[9].mxu1 }
 0x335   : > { %v1021_v6 = vpop.f32.mrb[10].mxu1 }
 0x336   : > { %v2198_v7 = vpop.f32.mrb[11].mxu1 }
 0x337   : > { %v1068_v8 = vpop.f32.mrb[12].mxu0 }
 0x338   : > { %v1125_v9 = vmax.f32 %v1124_v4, %v1068_v8  ;;  %v2203_v10 = vpop.f32.mrb[13].mxu0 }
 0x339   : > { %v1071_v11 = vpop.f32.mrb[14].mxu0 }
 0x33a   : > { %v2204_v12 = vpop.f32.mrb[15].mxu0 }
 0x33b   : > { %v1118_v13 = vpop.f32.mrb[12].mxu1 }
 0x33c   : > { %v1126_v14 = vmax.f32 %v1125_v9, %v1118_v13  ;;  %v2209_v15 = vpop.f32.mrb[13].mxu1 }
 0x33d   : > { %v1121_v16 = vpop.f32.mrb[14].mxu1 }
 0x33e   : > { %v1127_v17 = vsub.f32 %v964_v59, %v1126_v14  ;;  %v1130_v18 = vsub.f32 %v1018_v3, %v1126_v14  ;;  %v1134_v19 = vsub.f32 %v1068_v8, %v1126_v14  ;;  %v1138_v20 = vsub.f32 %v1118_v13, %v1126_v14  ;;  %v2210_v21 = vpop.f32.mrb[15].mxu1 }
 0x340   : > { %v1128_v22 = vmul.f32 1.442695, %v1127_v17  ;;  %v1131_v23 = vmul.f32 1.442695, %v1130_v18  ;;  %v1135_v24 = vmul.f32 1.442695, %v1134_v19 }
 0x341   : > { %v1139_v25 = vmul.f32 1.442695, %v1138_v20 }
 0x342   : > { %2418 = vpow2.f32 %v1128_v22 }
 0x343   : > { %2420 = vpow2.f32 %v1131_v23 }
 0x344   : > { %2422 = vpow2.f32 %v1135_v24 }
 0x345   : > { %2424 = vpow2.f32 %v1139_v25 }
 0x34c   : > { %v2419_v26 = vpop.eup %2418 }
 0x34d   : > { %v2421_v27 = vpop.eup %2420 }
 0x34e   : > { %v1133_v28 = vadd.f32 %v2421_v27, %v2419_v26  ;;  %v2423_v29 = vpop.eup %2422 }
 0x34f   : > { %v2425_v31 = vpop.eup %2424 }
 0x350   : > { %v1137_v30 = vadd.f32 %v2423_v29, %v1133_v28 }
 0x352   : > { %v1141_v32 = vadd.f32 %v2425_v31, %v1137_v30 }
 0x354   : > { %2426 = vrcp.f32 %v1141_v32 }
 0x35e   : > { %v2427_v33 = vpop.eup %2426 }
 0x35f   : > { %v1143_v34 = vmul.f32 %v2427_v33, %v2419_v26  ;;  %v1193_v35 = vmul.f32 %v2427_v33, %v2421_v27  ;;  %v1246_v36 = vmul.f32 %v2427_v33, %v2423_v29  ;;  %v1296_v37 = vmul.f32 %v2427_v33, %v2425_v31 }
 0x361   : > { %v1144_v43 = vpack.c.bf16 %v1143_v34, %v1143_v34  ;;  %v1194_v44 = vpack.c.bf16 %v1193_v35, %v1193_v35  ;;  %v1247_v46 = vpack.c.bf16 %v1246_v36, %v1246_v36  ;;  %v1297_v47 = vpack.c.bf16 %v1296_v37, %v1296_v37 }
 0x363   : > { %2214 = vmatmul.mubr.msk.bf16.vlgmr.msra.gmra.mrb[16].mxu0 %vm923_vm3, %v1144_v43  ;;  %2220 = vmatmul.mubr.msk.bf16.vlgmr.msra.gmra.mrb[16].mxu1 %vm923_vm3, %v1194_v44 }
 0x364   : > { %2224 = vmatpush3.bf16.msra.mxu0 %v1254_v41  ;;  %2230 = vmatpush3.bf16.msra.mxu1 %v1304_v42 }
 0x365   : > { %2225 = vmatprep.mubr.msk.bf16.mxu0 %vm2784_vm0, %v2783_v0  ;;  %2231 = vmatprep.mubr.msk.bf16.mxu1 %vm2784_vm0, %v2783_v0 }
 0x366   : > { %2235 = vmatprep.subr.bf16.mxu0 %v2783_v0  ;;  %2241 = vmatprep.subr.bf16.mxu1 %v2783_v0 }
 0x36b   : > { %2226 = vmatmul.mubr.msk.bf16.vlgmr.msra.gmra.mrb[20].mxu0 %vm923_vm3, %v1247_v46  ;;  %2232 = vmatmul.mubr.msk.bf16.vlgmr.msra.gmra.mrb[20].mxu1 %vm923_vm3, %v1297_v47 }
 0x36c   : > { %2237 = vmatprep.mubr.msk.bf16.mxu0 %vm2784_vm0, %v2783_v0  ;;  %2243 = vmatprep.mubr.msk.bf16.mxu1 %vm2784_vm0, %v2783_v0 }
 0x36d   : > { %2236 = vmatpush3.bf16.xpose.msra.mxu0 %v1369_v50  ;;  %2242 = vmatpush3.bf16.xpose.msra.mxu1 %v1423_v49  ;;  %v1739_v49 = vpop.permute.xlu1 %1738 }
 0x36e   : > { %2247 = vmatprep.subr.bf16.mxu0 %v2783_v0  ;;  %2253 = vmatprep.subr.bf16.mxu1 %v2783_v0 }
 0x374   : > { %2238 = vmatmul.mubr.msk.bf16.vlgmr.msra.gmra.mrb[24].mxu0 %vm923_vm3, %v3277_v51  ;;  %2244 = vmatmul.mubr.msk.bf16.vlgmr.msra.gmra.mrb[24].mxu1 %vm923_vm3, %v1413_v53  ;;  %v1591_v51 = vsel %vm1149_vm4, %v3303_v1, 0 }
 0x375   : > { %2248 = vmatpush3.bf16.xpose.msra.mxu0 %v1473_v54  ;;  %2254 = vmatpush3.bf16.xpose.msra.mxu1 %v1523_v55  ;;  %v1694_v55 = vsel %vm1149_vm4, %v1689_v48, 0 }
 0x376   : > { %2249 = vmatprep.mubr.msk.bf16.mxu0 %vm2784_vm0, %v2783_v0  ;;  %2255 = vmatprep.mubr.msk.bf16.mxu1 %vm2784_vm0, %v2783_v0 }
 0x377   : > { %2259 = vmatprep.subr.bf16.mxu0 %v2783_v0  ;;  %2265 = vmatprep.subr.bf16.mxu1 %v2783_v0 }
 0x37c   : > { %2250 = vmatmul.mubr.msk.bf16.vlgmr.msra.gmra.mrb[28].mxu0 %vm923_vm3, %v1466_v56  ;;  %2256 = vmatmul.mubr.msk.bf16.vlgmr.msra.gmra.mrb[28].mxu1 %vm923_vm3, %v1516_v39 }
 0x37d   : > { %2261 = vmatprep.mubr.msk.bf16.mxu0 %vm2784_vm0, %v2783_v0  ;;  %2267 = vmatprep.mubr.msk.bf16.mxu1 %vm2784_vm0, %v2783_v0 }
 0x37e   : > { %2260 = vmatpush3.bf16.msra.mxu0 %v1591_v51  ;;  %2266 = vmatpush3.bf16.msra.mxu1 %v1644_v58  ;;  %v1744_v51 = vsel %vm1149_vm4, %v1739_v49, 0 }
 0x37f   : > { %2271 = vmatprep.subr.bf16.mxu0 %v2783_v0  ;;  %2277 = vmatprep.subr.bf16.mxu1 %v2783_v0 }
 0x436   : > { %v3353_v59 = vpop.f32.mrb[16].mxu0  ;;  %v1240_v60 = vpop.f32.mrb[16].mxu1 }
 0x437   : > { %1347 = vrot.lane.b32.xlu0 %v1240_v60, %s2788_s22  ;;  %v2215_v61 = vpop.f32.mrb[17].mxu0  ;;  %v2221_v62 = vpop.f32.mrb[17].mxu1 }
 0x438   : > { %v1190_v63 = vpop.f32.mrb[18].mxu0  ;;  %v1243_v2 = vpop.f32.mrb[18].mxu1 }
 0x439   : > { %v2216_v1 = vpop.f32.mrb[19].mxu0  ;;  %v2222_v3 = vpop.f32.mrb[19].mxu1 }
 0x43e   : > { %v1290_v4 = vpop.f32.mrb[20].mxu0  ;;  %v1340_v5 = vpop.f32.mrb[20].mxu1 }
 0x43f   : > { %v2233_v6 = vpop.f32.mrb[21].mxu1  ;;  %1351 = vrot.lane.b32.xlu0 %v1290_v4, %s2789_s0  ;;  %v2227_v7 = vpop.f32.mrb[21].mxu0 }
 0x440   : > { %v1293_v8 = vpop.f32.mrb[22].mxu0  ;;  %v1343_v9 = vpop.f32.mrb[22].mxu1 }
 0x441   : > { %v2228_v10 = vpop.f32.mrb[23].mxu0  ;;  %v2234_v11 = vpop.f32.mrb[23].mxu1 }
 0x443   : > { %1355 = vrot.lane.b32.xlu0 %v1340_v5, %s2790_s6 }
 0x447   : > { %v1405_v12 = vpop.f32.mrb[24].mxu0  ;;  %v1459_v13 = vpop.f32.mrb[24].mxu1 }
 0x448   : > { %v1565_v14 = vmax.f32 %v1405_v12, %v1459_v13  ;;  %v2239_v15 = vpop.f32.mrb[25].mxu0  ;;  %v2245_v16 = vpop.f32.mrb[25].mxu1 }
 0x449   : > { %v1408_v17 = vpop.f32.mrb[26].mxu0  ;;  %v1462_v18 = vpop.f32.mrb[26].mxu1 }
 0x44a   : > { %v2240_v19 = vpop.f32.mrb[27].mxu0  ;;  %v2246_v20 = vpop.f32.mrb[27].mxu1 }
 0x44f   : > { %v1509_v21 = vpop.f32.mrb[28].mxu0  ;;  %v1559_v22 = vpop.f32.mrb[28].mxu1 }
 0x450   : > { %v1566_v23 = vmax.f32 %v1565_v14, %v1509_v21  ;;  %v2251_v24 = vpop.f32.mrb[29].mxu0  ;;  %v2257_v25 = vpop.f32.mrb[29].mxu1 }
 0x451   : > { %v1512_v26 = vpop.f32.mrb[30].mxu0  ;;  %v1562_v27 = vpop.f32.mrb[30].mxu1 }
 0x452   : > { %v1567_v28 = vmax.f32 %v1566_v23, %v1559_v22  ;;  %v2252_v29 = vpop.f32.mrb[31].mxu0  ;;  %v2258_v30 = vpop.f32.mrb[31].mxu1 }
 0x454   : > { %v1568_v31 = vsub.f32 %v1405_v12, %v1567_v28  ;;  %v1571_v32 = vsub.f32 %v1459_v13, %v1567_v28  ;;  %v1575_v33 = vsub.f32 %v1509_v21, %v1567_v28  ;;  %v1579_v34 = vsub.f32 %v1559_v22, %v1567_v28 }
 0x456   : > { %v1569_v35 = vmul.f32 1.442695, %v1568_v31  ;;  %v1572_v36 = vmul.f32 1.442695, %v1571_v32  ;;  %v1576_v37 = vmul.f32 1.442695, %v1575_v33 }
 0x457   : > { %v1580_v38 = vmul.f32 1.442695, %v1579_v34 }
 0x458   : > { %2428 = vpow2.f32 %v1569_v35 }
 0x459   : > { %2430 = vpow2.f32 %v1572_v36 }
 0x45a   : > { %2432 = vpow2.f32 %v1576_v37 }
 0x45b   : > { %2434 = vpow2.f32 %v1580_v38 }
 0x462   : > { %v2429_v40 = vpop.eup %2428 }
 0x463   : > { %v2431_v41 = vpop.eup %2430 }
 0x464   : > { %v1574_v42 = vadd.f32 %v2431_v41, %v2429_v40  ;;  %v2433_v43 = vpop.eup %2432 }
 0x465   : > { %v2435_v45 = vpop.eup %2434 }
 0x466   : > { %v1578_v44 = vadd.f32 %v2433_v43, %v1574_v42 }
 0x468   : > { %v1582_v46 = vadd.f32 %v2435_v45, %v1578_v44 }
 0x46a   : > { %2436 = vrcp.f32 %v1582_v46 }
 0x474   : > { %v2437_v47 = vpop.eup %2436 }
 0x475   : > { %v1584_v50 = vmul.f32 %v2437_v47, %v2429_v40  ;;  %v1633_v52 = vmul.f32 %v2437_v47, %v2431_v41  ;;  %v1686_v53 = vmul.f32 %v2437_v47, %v2433_v43  ;;  %v1736_v54 = vmul.f32 %v2437_v47, %v2435_v45 }
 0x477   : > { %v1585_v39 = vpack.c.bf16 %v1584_v50, %v1584_v50  ;;  %v1634_v56 = vpack.c.bf16 %v1633_v52, %v1633_v52  ;;  %v1687_v57 = vpack.c.bf16 %v1686_v53, %v1686_v53  ;;  %v1737_v58 = vpack.c.bf16 %v1736_v54, %v1736_v54 }
 0x479   : > { %2262 = vmatmul.mubr.msk.bf16.vlgmr.msra.gmra.mrb[32].mxu0 %vm923_vm3, %v1585_v39  ;;  %2268 = vmatmul.mubr.msk.bf16.vlgmr.msra.gmra.mrb[32].mxu1 %vm923_vm3, %v1634_v56 }
 0x47a   : > { %2272 = vmatpush3.bf16.msra.mxu0 %v1694_v55  ;;  %2278 = vmatpush3.bf16.msra.mxu1 %v1744_v51 }
 0x47b   : > { %2273 = vmatprep.mubr.msk.bf16.mxu0 %vm2784_vm0, %v2783_v0  ;;  %2279 = vmatprep.mubr.msk.bf16.mxu1 %vm2784_vm0, %v2783_v0 }
 0x481   : > { %2274 = vmatmul.mubr.msk.bf16.vlgmr.msra.gmra.mrb[36].mxu0 %vm923_vm3, %v1687_v57  ;;  %2280 = vmatmul.mubr.msk.bf16.vlgmr.msra.gmra.mrb[36].mxu1 %vm923_vm3, %v1737_v58 }
 0x4a9   : > { %v1348_v60 = vpop.permute.xlu0 %1347 }
 0x4aa   : > { %v1358_v62 = vsel %vm923_vm3, %v3353_v59, %v1348_v60 }
 0x4b1   : > { %v1352_v61 = vpop.permute.xlu0 %1351 }
 0x4b2   : > { %v1360_v63 = vsel %vm1359_vm5, %v1358_v62, %v1352_v61 }
 0x4b5   : > { %v1356_v2 = vpop.permute.xlu0 %1355 }
 0x4b6   : > { %v1362_v0 = vsel %vm1361_vm6, %v1360_v63, %v1356_v2 }
 0x4b7   : > { %1363 = vst.msk [vmem:[%s632_s11] sm:$0xff] %vm669_vm1, %v1362_v0 }
 0x54c   : > { %v1627_v1 = vpop.f32.mrb[32].mxu0  ;;  %v1680_v3 = vpop.f32.mrb[32].mxu1 }
 0x54d   : > { %1787 = vrot.lane.b32.xlu1 %v1680_v3, %s2788_s22  ;;  %v2263_v4 = vpop.f32.mrb[33].mxu0  ;;  %v2269_v5 = vpop.f32.mrb[33].mxu1 }
 0x54e   : > { %v1630_v59 = vpop.f32.mrb[34].mxu0  ;;  %v1683_v6 = vpop.f32.mrb[34].mxu1 }
 0x54f   : > { %v2264_v7 = vpop.f32.mrb[35].mxu0  ;;  %v2270_v8 = vpop.f32.mrb[35].mxu1 }
 0x550   : > { %2655 = shalt.err (!%p2652_p7)
}
 0x551   : > { %s2656_s23 = scalar_lea.hbm %s3383_s12, 128  ;;  %s2660_s17 = scalar_lea.hbm %s3556_s10, 256 }
 0x552   : > { %p2657_p10 = scmp.ne.s32.totalorder %s3383_s12, %s2656_s23  ;;  %p2661_p4 = scmp.lt.u32.totalorder %s3383_s12, %s3556_s10 }
 0x553   : > { %p2662_p1 = scmp.lt.u32.totalorder %s2660_s17, %s2656_s23  ;;  %p2664_p13 = scmp.lt.u32.totalorder %s2656_s23, %s3383_s12 }
 0x554   : > { %p2658_p6 = pnand %p2657_p10, %p3557_p12 }
 0x555   : > { %p2663_p8 = por %p2662_p1, %p2661_p4 }
 0x556   : > { %p2659_p2 = pneg %p2658_p6 }
 0x557   : > { %p2665_p3 = por %p2664_p13, %p2663_p8 }
 0x559   : > { %p2666_p0 = pnand %p2665_p3, %p2659_p2 }
 0x55b   : > { %2669 = shalt.err (!%p2666_p0)
}
 0x55c   : > { %2303 = dma.vmem_to_hbm [thread:$0]  (%p3557_p12), %s3385_s1, 128, %s3383_s12, %s1803_s4   ;;  %v1730_v9 = vpop.f32.mrb[36].mxu0  ;;  %v1780_v10 = vpop.f32.mrb[36].mxu1 }
 0x55d   : > { %v2281_v11 = vpop.f32.mrb[37].mxu1  ;;  %1791 = vrot.lane.b32.xlu1 %v1730_v9, %s2789_s0  ;;  %v2275_v12 = vpop.f32.mrb[37].mxu0  ;;  %s639_s13 = scalar_lea.vmem [#allocation17], %s2067_s16  ;;  %s3558_s1 = sld [smem:[#allocation41_spill]] }
 0x55e   : > { %v1733_v13 = vpop.f32.mrb[38].mxu0  ;;  %v1783_v14 = vpop.f32.mrb[38].mxu1  ;;  %s1836_s21 = sshll.u32 %s639_s13, 4  ;;  %s2792_s24 = smov [#allocation17]   ;;  %s3422_s21 = int_to_ptr.vmem [resolvable:$true] %s1836_s21 }
 0x55f   : > { %v2276_v15 = vpop.f32.mrb[39].mxu0  ;;  %v2282_v16 = vpop.f32.mrb[39].mxu1  ;;  %s2670_s16 = scalar_lea.vmem %s3422_s21, 128  ;;  %s2674_s19 = sshll.u32 %s2792_s24, 4  ;;  %s2675_s19 = int_to_ptr.vmem [resolvable:$false] %s2674_s19 }
 0x560   : > { %p2671_p11 = scmp.ne.s32.totalorder %s3422_s21, %s2670_s16  ;;  %p2677_p7 = scmp.lt.s32.totalorder %s3422_s21, %s2675_s19 }
 0x561   : > { %1795 = vrot.lane.b32.xlu1 %v1780_v10, %s2790_s6  ;;  %s1808_s6 = scalar_lea.sflag [#allocation18], %s3168_s28 }
 0x562   : > { %p2672_p9 = pnand %p2671_p11, %p3557_p12 }
 0x563   : > { %s3420_s4 = scalar_lea.hbm %s3558_s1, %s2107_s20  ;;  %s2676_s20 = scalar_lea.vmem %s2675_s19, 256 }
 0x564   : > { %p2673_p5 = pneg %p2672_p9  ;;  %p2678_p10 = scmp.lt.s32.totalorder %s2676_s20, %s2670_s16 }
 0x566   : > { %p2679_p6 = por %p2678_p10, %p2677_p7 }
 0x568   : > { %p2680_p2 = pnand %p2679_p6, %p2673_p5 }
 0x5bf   : > { %v1788_v17 = vpop.permute.xlu1 %1787 }
 0x5c0   : > { %v1798_v19 = vsel %vm923_vm3, %v1627_v1, %v1788_v17 }
 0x5cf   : > { %v1792_v18 = vpop.permute.xlu1 %1791 }
 0x5d0   : > { %v1799_v20 = vsel %vm1359_vm5, %v1798_v19, %v1792_v18 }
 0x5d3   : > { %v1796_v21 = vpop.permute.xlu1 %1795 }
 0x5d4   : > { %v1800_v22 = vsel %vm1361_vm6, %v1799_v20, %v1796_v21 }
 0x5d5   : > { %1801 = vst.msk [vmem:[%s639_s13] sm:$0xff] %vm669_vm1, %v1800_v22 }
 0x5d6   : > { %2683 = shalt.err (!%p2680_p2)
}
 0x5d7   : > { %s2684_s28 = scalar_lea.hbm %s3420_s4, 128  ;;  %s2688_s8 = scalar_lea.hbm %s3558_s1, 256 }
 0x5d8   : > { %p2685_p4 = scmp.ne.s32.totalorder %s3420_s4, %s2684_s28  ;;  %p2689_p13 = scmp.lt.u32.totalorder %s3420_s4, %s3558_s1 }
 0x5d9   : > { %p2690_p3 = scmp.lt.u32.totalorder %s2688_s8, %s2684_s28  ;;  %p2692_p11 = scmp.lt.u32.totalorder %s2684_s28, %s3420_s4 }
 0x5da   : > { %p2686_p1 = pnand %p2685_p4, %p3557_p12 }
 0x5db   : > { %p2691_p0 = por %p2690_p3, %p2689_p13 }
 0x5dc   : > { %p2687_p8 = pneg %p2686_p1 }
 0x5dd   : > { %p2693_p9 = por %p2692_p11, %p2691_p0 }
 0x5df   : > { %p2694_p5 = pnand %p2693_p9, %p2687_p8 }
 0x5e1   : > { %2697 = shalt.err (!%p2694_p5)
}
 0x5e2   : > { %2304 = dma.vmem_to_hbm [thread:$0]  (%p3557_p12), %s3422_s21, 128, %s3420_s4, %s1808_s6  }
 0x5e3 PF: > { %s3559_s25 = sld [smem:[#allocation26_spill]]  ;;  %s3560_s17 = sld [smem:[#allocation29_spill]] }
 0x5e4   : > { %p3562_p10 = scmp.ge.s32.totalorder %s2772_s30, 2 }
 0x5e9   : > { %s1848_s22 = sand.u32 1, %s3559_s25   ;;  %p3561_p7 = scmp.ne.s32.totalorder %s3560_s17, 0 }
 0x5ea   : > { %s1849_s11 = scalar_lea.sflag [#allocation6], %s1848_s22 }
 0x5eb   : > { %p2331_p6 = pnand %p3562_p10, %p3561_p7 }
 0x5ed   : > { %2743 = dma.done.wait (!%p2331_p6), %s1849_s11, 128  }
 0x5ee   : > { %2745 = vsyncadd (!%p2331_p6), %s1849_s11, 4294967168  ;;  %s1858_s13 = scalar_lea.sflag [#allocation18], %s1848_s22 }
 0x5ef   : > { %2747 = dma.done.wait (!%p2331_p6), %s1858_s13, 128  }
 0x5f0   : > { %2749 = vsyncadd (!%p2331_p6), %s1858_s13, 4294967168  ;;  %s40_s30 = sadd.s32 1, %s2772_s30   ;;  %s3563_s14 = sld [smem:[#allocation32_spill]] }
 0x5f1   : > { %p37_p2 = scmp.ge.s32.totalorder %s40_s30, 4   ;;  %s3564_s28 = sld [smem:[#allocation28_spill]] }
 0x5f2   : > { %s3565_s29 = sld [smem:[#allocation30_spill]]  ;;  %s3566_s25 = smov %s2756_s26 }
 0x5f3   : > { %s3567_s26 = smov %s2760_s27  ;;  %39 = sbr.rel (!%p37_p2) target bundleno = 23 (0x17), region = 183 }
 0x5f6   : > { %s3568_s27 = smov %s3563_s14 }
 0x5fa   :  { %1863 = vsyncpa [#allocation5], 1 }
 0x5fb   :  { %1865 = vsyncpa [#allocation5 + $0x1], 1 }
 0x5fc   :  { %1866 = vsyncpa [#allocation8], 1 }
 0x5fd   :  { %1868 = vsyncpa [#allocation8 + $0x1], 1 }
 0x5fe   :  { %1869 = vsyncpa [#allocation11], 1 }
 0x5ff   :  { %1871 = vsyncpa [#allocation11 + $0x1], 1 }
 0x600   :  { %1872 = vsyncpa [#allocation14], 1 }
 0x601   :  { %1873 = vsyncpa [#allocation6], 1 }
 0x602   :  { %1875 = vsyncpa [#allocation6 + $0x1], 1 }
 0x603   :  { %1876 = vsyncpa [#allocation18], 1 }
 0x604   :  { %1878 = vsyncpa [#allocation18 + $0x1], 1 }

</bundles_post_ra>
